<compile_context>
chip_gen: v7x
topology: tpu7x:2x2x1
jax: 0.10.0
libtpu: 0.0.40
codegen_flags: <defaults>
</compile_context>

<pallas_src>
import functools

import numpy as np

import jax
import jax.numpy as jnp
from jax.experimental import pallas as pl
from jax.experimental.pallas import tpu as pltpu


# ----------------------------------------------------------------------------
# Fused whole-network kernel: 4 MXU dots per batch tile.
# ----------------------------------------------------------------------------
def _lenet_kernel(x_ref, w1_ref, b1_ref, w2_ref, b2_ref,
                  w3_ref, b3_ref, w4_ref, b4_ref, out_ref, *, tile_b):
    f32 = jnp.float32
    bf16 = jnp.bfloat16
    TB = tile_b

    # ---------------- conv1 + maxpool(2) + relu : one K=168 dot -------------
    # x block: (12, TB, 168) bf16; slab index = g*6 + s holds image rows
    # {4s+2g+j : j=0..5} lane-packed (lane = 28*j + col).  Row (g*6+s)*TB + b
    # corresponds to pooled row p1 = 2s + g.
    lhs1 = x_ref[...].reshape(12 * TB, 168)
    a1 = jnp.dot(lhs1, w1_ref[...], preferred_element_type=f32)     # (12TB, 512)
    # 4 output 128-lane blocks = (dy, output-col parity) pooling variants.
    m1 = jnp.maximum(jnp.maximum(a1[:, 0:128], a1[:, 128:256]),
                     jnp.maximum(a1[:, 256:384], a1[:, 384:512]))
    h1 = jnp.maximum(m1 + b1_ref[...], 0.0).astype(bf16)            # (12TB, 128)
    # h1 lane = q1*10 + c (120 used), rows (g*6+s)*TB + b <-> pooled row 2s+g.

    # ---------------- conv2 + maxpool(2) + relu : one K=768 dot -------------
    def h1_win(y):           # h1 rows {2*p2 + y : p2 = 0..3} as (4TB, 128)
        off = ((y & 1) * 6 + (y >> 1)) * TB
        return h1[off:off + 4 * TB, :]
    lhs2 = jnp.concatenate([h1_win(y) for y in range(6)], axis=1)   # (4TB, 768)
    a2 = jnp.dot(lhs2, w2_ref[...], preferred_element_type=f32)     # (4TB, 512)
    m2 = jnp.maximum(jnp.maximum(a2[:, 0:128], a2[:, 128:256]),
                     jnp.maximum(a2[:, 256:384], a2[:, 384:512]))
    h2 = jnp.maximum(m2 + b2_ref[...], 0.0).astype(bf16)            # (4TB, 128)
    # h2 lane = q2*20 + o (80 used), rows p2*TB + b.

    # ---------------- fc1 + relu : one (TB,512) x (512,128) dot -------------
    lhs3 = jnp.concatenate([h2[p * TB:(p + 1) * TB, :] for p in range(4)],
                           axis=1)                                  # (TB, 512)
    a3 = jnp.dot(lhs3, w3_ref[...], preferred_element_type=f32) + b3_ref[...]
    a3 = jnp.maximum(a3, 0.0).astype(bf16)                          # (TB, 128)

    # ---------------- fc2 (lane-dense 128-wide output, cols >= 25 zero) -----
    out_ref[...] = jnp.dot(a3, w4_ref[...], preferred_element_type=f32) + b4_ref[...]


# ----------------------------------------------------------------------------
# One-time parameter packing (gate folding, banding, permutation, padding).
# ----------------------------------------------------------------------------
def pack_params(params):
    f32 = jnp.float32
    bf16 = jnp.bfloat16

    # --- conv1: ArmConv2d(1 -> 10, k=5), output-channel gates ---------------
    g1 = jax.nn.sigmoid(params["z_phi1"])                           # (10,)
    w1f = params["conv1_w"][:, 0] * g1[:, None, None]               # (10, 5, 5)
    b1f = params["conv1_b"] * g1
    dy, i, q, c, pr, j = (a.ravel() for a in np.meshgrid(
        np.arange(2), np.arange(5), np.arange(12), np.arange(10),
        np.arange(2), np.arange(5), indexing="ij"))
    # K row = 28*(dy+i) + (2q + pr + j)  [input row-in-slab, col]
    # lane  = (2*dy + pr)*128 + q*10 + c  [pooling-window variant block]
    W1 = jnp.zeros((168, 512), f32).at[
        28 * (dy + i) + 2 * q + pr + j,
        (2 * dy + pr) * 128 + q * 10 + c].set(w1f[c, i, j])
    b1p = jnp.zeros((1, 128), f32).at[0, :120].set(jnp.tile(b1f, 12))

    # --- conv2: ArmConv2d(10 -> 20, k=5) ------------------------------------
    g2 = jax.nn.sigmoid(params["z_phi2"])                           # (20,)
    w2f = params["conv2_w"] * g2[:, None, None, None]               # (20,10,5,5)
    b2f = params["conv2_b"] * g2
    dy, i, q, o, c, pr, j = (a.ravel() for a in np.meshgrid(
        np.arange(2), np.arange(5), np.arange(4), np.arange(20),
        np.arange(10), np.arange(2), np.arange(5), indexing="ij"))
    # K row = (dy+i)*128 + (2q + pr + j)*10 + c   [h1 row-window, h1 lane]
    W2 = jnp.zeros((768, 512), f32).at[
        (dy + i) * 128 + (2 * q + pr + j) * 10 + c,
        (2 * dy + pr) * 128 + q * 20 + o].set(w2f[o, c, i, j])
    b2p = jnp.zeros((1, 128), f32).at[0, :80].set(jnp.tile(b2f, 4))

    # --- fc1: ARMDense(320 -> 100), input-feature gates; rows permuted to the
    #     kernel's (p2*128 + q2*20 + o) layout; PyTorch NCHW flatten
    #     f = o*16 + p2*4 + q2.
    g3 = jax.nn.sigmoid(params["z_phi3"])                           # (320,)
    w3g = params["fc1_w"] * g3[None, :]                             # (100, 320)
    p, q, o, n = (a.ravel() for a in np.meshgrid(
        np.arange(4), np.arange(4), np.arange(20), np.arange(100), indexing="ij"))
    W3 = jnp.zeros((512, 128), f32).at[
        p * 128 + q * 20 + o, n].set(w3g[n, o * 16 + p * 4 + q])
    b3p = jnp.zeros((1, 128), f32).at[0, :100].set(params["fc1_b"])

    # --- fc2: ARMDense(100 -> 25), input gates; padded 128x128 lane-dense ---
    g4 = jax.nn.sigmoid(params["z_phi4"])                           # (100,)
    w4g = (params["fc2_w"] * g4[None, :]).T                         # (100, 25)
    W4 = jnp.zeros((128, 128), f32).at[:100, :25].set(w4g)
    b4p = jnp.zeros((1, 128), f32).at[0, :25].set(params["fc2_b"])

    return {"w1": W1.astype(bf16), "b1": b1p,
            "w2": W2.astype(bf16), "b2": b2p,
            "w3": W3.astype(bf16), "b3": b3p,
            "w4": W4.astype(bf16), "b4": b4p}


# ----------------------------------------------------------------------------
# Forward: one fused pallas_call, batch-tiled "parallel" grid.
# ----------------------------------------------------------------------------
def arm_lenet5_forward(x_nchw, packed, *, tile_b=256):
    B = x_nchw.shape[0]
    assert x_nchw.shape[1:] == (1, 28, 28), x_nchw.shape

    # Batch tile: multiple of 16 (bf16 sublane packing).  Clamp so the grid has
    # >= 2 steps when the batch allows it (v7x: 2 TensorCores share the
    # "parallel" axis).  On v5e/v6e the extra grid step costs ~0.35 us.
    half16 = ((-(-B // 2)) + 15) // 16 * 16
    tile_b = max(16, min(tile_b, half16))
    assert tile_b % 16 == 0

    Bp = -(-B // tile_b) * tile_b
    x = x_nchw.reshape(B, 28, 28).astype(jnp.bfloat16)
    if Bp != B:
        x = jnp.pad(x, ((0, Bp - B), (0, 0), (0, 0)))

    # Lane-packed conv1 LHS (built once, XLA side): slab g*6+s carries image
    # rows 4s+2g .. 4s+2g+5 concatenated along lanes (6*28 = 168), batch on
    # sublanes.  bf16 halves input DMA bytes (v5e HBM BW win).
    slabs = [x[:, 4 * s + 2 * g: 4 * s + 2 * g + 6, :].reshape(Bp, 168)
             for g in range(2) for s in range(6)]
    xp = jnp.stack(slabs, axis=0)                                   # (12, Bp, 168)
    nb = Bp // tile_b

    out = pl.pallas_call(
        functools.partial(_lenet_kernel, tile_b=tile_b),
        grid=(nb,),
        in_specs=[
            pl.BlockSpec((12, tile_b, 168), lambda b: (0, b, 0)),   # packed image
            pl.BlockSpec((168, 512), lambda b: (0, 0)),             # conv1 banded
            pl.BlockSpec((1, 128), lambda b: (0, 0)),               # b1
            pl.BlockSpec((768, 512), lambda b: (0, 0)),             # conv2 banded
            pl.BlockSpec((1, 128), lambda b: (0, 0)),               # b2
            pl.BlockSpec((512, 128), lambda b: (0, 0)),             # fc1
            pl.BlockSpec((1, 128), lambda b: (0, 0)),               # b3
            pl.BlockSpec((128, 128), lambda b: (0, 0)),             # fc2
            pl.BlockSpec((1, 128), lambda b: (0, 0)),               # b4
        ],
        out_specs=pl.BlockSpec((tile_b, 128), lambda b: (b, 0)),
        out_shape=jax.ShapeDtypeStruct((Bp, 128), jnp.float32),
        compiler_params=pltpu.CompilerParams(
            dimension_semantics=("parallel",),          # megacore sharding
            vmem_limit_bytes=48 * 1024 * 1024),         # safe on v7x's 64 MiB VMEM
    )(xp,
      packed["w1"], packed["b1"], packed["w2"], packed["b2"],
      packed["w3"], packed["b3"], packed["w4"], packed["b4"])

    return out[:B, :25]


# ----------------------------------------------------------------------------
# Pure-JAX reference (eval-mode, same gate convention) for a correctness check.
# ----------------------------------------------------------------------------
def reference_forward(x_nchw, params):
    x = x_nchw.astype(jnp.float32)

    def conv_pool(o, w, b, g):
        wf = w * g[:, None, None, None]
        bf = b * g
        o = jax.lax.conv_general_dilated(
            o, wf, (1, 1), "VALID", dimension_numbers=("NCHW", "OIHW", "NCHW"))
        o = o + bf[None, :, None, None]
        o = jax.lax.reduce_window(o, -jnp.inf, jax.lax.max,
                                  (1, 1, 2, 2), (1, 1, 2, 2), "VALID")
        return jax.nn.relu(o)

    o = conv_pool(x, params["conv1_w"], params["conv1_b"],
                  jax.nn.sigmoid(params["z_phi1"]))
    o = conv_pool(o, params["conv2_w"], params["conv2_b"],
                  jax.nn.sigmoid(params["z_phi2"]))
    flat = o.reshape(o.shape[0], -1)                       # PyTorch NCHW flatten
    g3 = jax.nn.sigmoid(params["z_phi3"])
    h = jax.nn.relu((flat * g3[None, :]) @ params["fc1_w"].T + params["fc1_b"])
    g4 = jax.nn.sigmoid(params["z_phi4"])
    return (h * g4[None, :]) @ params["fc2_w"].T + params["fc2_b"]


def init_params(seed=42):
    ks = jax.random.split(jax.random.PRNGKey(seed), 12)
    n = lambda k, s, sc=0.1: (sc * jax.random.normal(k, s)).astype(jnp.float32)
    return {
        "conv1_w": n(ks[0], (10, 1, 5, 5)),
        "conv1_b": n(ks[1], (10,)),
        "z_phi1":  n(ks[2], (10,), 0.5),
        "conv2_w": n(ks[3], (20, 10, 5, 5)),
        "conv2_b": n(ks[4], (20,)),
        "z_phi2":  n(ks[5], (20,), 0.5),
        "fc1_w":   n(ks[6], (100, 320)),
        "fc1_b":   n(ks[7], (100,)),
        "z_phi3":  n(ks[8], (320,), 0.5),
        "fc2_w":   n(ks[9], (25, 100)),
        "fc2_b":   n(ks[10], (25,)),
        "z_phi4":  n(ks[11], (100,), 0.5),
    }


if __name__ == "__main__":
    params = init_params()
    packed = pack_params(params)               # gate folding / banding, hoisted

    x = jax.random.normal(jax.random.PRNGKey(0), (2, 1, 28, 28),
                          dtype=jnp.float32)

    fwd = jax.jit(functools.partial(arm_lenet5_forward))   # tile auto-clamps for tiny batch
    score = jax.block_until_ready(fwd(x, packed))

    assert score.shape == (2, 25), score.shape
    assert bool(jnp.all(jnp.isfinite(score)))

    ref = reference_forward(x, params)
    err = float(jnp.max(jnp.abs(score - ref)))
    # NOTE: tolerance covers bf16 weight + input quantization vs the f32 reference.
    assert err < 0.05, f"mismatch vs pure-JAX reference: max abs err = {err}"

    print("KERNEL_OK")
</pallas_src>

<mosaic_0001>
module attributes {stable_mosaic.version = 11 : i64} {
  func.func @_lenet_kernel(%arg0: i32, %arg1: memref<12x16x168xbf16, #tpu.memory_space<vmem>>, %arg2: memref<168x512xbf16, #tpu.memory_space<vmem>>, %arg3: memref<1x128xf32, #tpu.memory_space<vmem>>, %arg4: memref<768x512xbf16, #tpu.memory_space<vmem>>, %arg5: memref<1x128xf32, #tpu.memory_space<vmem>>, %arg6: memref<512x128xbf16, #tpu.memory_space<vmem>>, %arg7: memref<1x128xf32, #tpu.memory_space<vmem>>, %arg8: memref<128x128xbf16, #tpu.memory_space<vmem>>, %arg9: memref<1x128xf32, #tpu.memory_space<vmem>>, %arg10: memref<16x128xf32, #tpu.memory_space<vmem>>) attributes {dimension_semantics = [#tpu.dimension_semantics<parallel>], iteration_bounds = array<i64: 1>, scalar_prefetch = 0 : i64, scratch_operands = 0 : i64, tpu.core_type = #tpu.core_type<tc>, window_params = [{transform_indices = @transform_0, window_bounds = array<i64: 12, 16, 168>}, {pipeline_mode = #tpu.pipeline_mode<synchronous>, transform_indices = @transform_1, window_bounds = array<i64: 168, 512>}, {pipeline_mode = #tpu.pipeline_mode<synchronous>, transform_indices = @transform_2, window_bounds = array<i64: 1, 128>}, {pipeline_mode = #tpu.pipeline_mode<synchronous>, transform_indices = @transform_3, window_bounds = array<i64: 768, 512>}, {pipeline_mode = #tpu.pipeline_mode<synchronous>, transform_indices = @transform_4, window_bounds = array<i64: 1, 128>}, {pipeline_mode = #tpu.pipeline_mode<synchronous>, transform_indices = @transform_5, window_bounds = array<i64: 512, 128>}, {pipeline_mode = #tpu.pipeline_mode<synchronous>, transform_indices = @transform_6, window_bounds = array<i64: 1, 128>}, {pipeline_mode = #tpu.pipeline_mode<synchronous>, transform_indices = @transform_7, window_bounds = array<i64: 128, 128>}, {pipeline_mode = #tpu.pipeline_mode<synchronous>, transform_indices = @transform_8, window_bounds = array<i64: 1, 128>}, {transform_indices = @transform_9, window_bounds = array<i64: 16, 128>}]} {
    %c0 = arith.constant 0 : index
    %c0_0 = arith.constant 0 : index
    %c0_1 = arith.constant 0 : index
    %0 = vector.load %arg1[%c0, %c0_0, %c0_1] : memref<12x16x168xbf16, #tpu.memory_space<vmem>>, vector<12x16x168xbf16>
    %1 = vector.shape_cast %0 : vector<12x16x168xbf16> to vector<192x168xbf16>
    %c0_2 = arith.constant 0 : index
    %c0_3 = arith.constant 0 : index
    %2 = vector.load %arg2[%c0_2, %c0_3] : memref<168x512xbf16, #tpu.memory_space<vmem>>, vector<168x512xbf16>
    %cst = arith.constant dense<0.000000e+00> : vector<192x512xf32>
    %3 = tpu.matmul %1, %2, %cst {dimension_numbers = #tpu.dot_dimension_numbers<[1], [0], [0], [1], [0, 0, 1, 1], [], []>} : vector<192x168xbf16>, vector<168x512xbf16>, vector<192x512xf32> -> vector<192x512xf32>
    %4 = vector.extract_strided_slice %3 {offsets = [0, 0], sizes = [192, 128], strides = [1, 1]} : vector<192x512xf32> to vector<192x128xf32>
    %5 = vector.extract_strided_slice %3 {offsets = [0, 128], sizes = [192, 128], strides = [1, 1]} : vector<192x512xf32> to vector<192x128xf32>
    %6 = arith.maximumf %4, %5 : vector<192x128xf32>
    %7 = vector.extract_strided_slice %3 {offsets = [0, 256], sizes = [192, 128], strides = [1, 1]} : vector<192x512xf32> to vector<192x128xf32>
    %8 = vector.extract_strided_slice %3 {offsets = [0, 384], sizes = [192, 128], strides = [1, 1]} : vector<192x512xf32> to vector<192x128xf32>
    %9 = arith.maximumf %7, %8 : vector<192x128xf32>
    %10 = arith.maximumf %6, %9 : vector<192x128xf32>
    %c0_4 = arith.constant 0 : index
    %c0_5 = arith.constant 0 : index
    %11 = vector.load %arg3[%c0_4, %c0_5] : memref<1x128xf32, #tpu.memory_space<vmem>>, vector<1x128xf32>
    %12 = vector.broadcast %11 : vector<1x128xf32> to vector<192x128xf32>
    %13 = arith.addf %10, %12 : vector<192x128xf32>
    %cst_6 = arith.constant 0.000000e+00 : f32
    %14 = vector.broadcast %cst_6 : f32 to vector<192x128xf32>
    %15 = arith.maximumf %13, %14 : vector<192x128xf32>
    %16 = arith.truncf %15 : vector<192x128xf32> to vector<192x128xbf16>
    %17 = vector.extract_strided_slice %16 {offsets = [0, 0], sizes = [64, 128], strides = [1, 1]} : vector<192x128xbf16> to vector<64x128xbf16>
    %18 = vector.extract_strided_slice %16 {offsets = [96, 0], sizes = [64, 128], strides = [1, 1]} : vector<192x128xbf16> to vector<64x128xbf16>
    %19 = vector.extract_strided_slice %16 {offsets = [16, 0], sizes = [64, 128], strides = [1, 1]} : vector<192x128xbf16> to vector<64x128xbf16>
    %20 = vector.extract_strided_slice %16 {offsets = [112, 0], sizes = [64, 128], strides = [1, 1]} : vector<192x128xbf16> to vector<64x128xbf16>
    %21 = vector.extract_strided_slice %16 {offsets = [32, 0], sizes = [64, 128], strides = [1, 1]} : vector<192x128xbf16> to vector<64x128xbf16>
    %22 = vector.extract_strided_slice %16 {offsets = [128, 0], sizes = [64, 128], strides = [1, 1]} : vector<192x128xbf16> to vector<64x128xbf16>
    %23 = tpu.concatenate %17, %18, %19, %20, %21, %22 in 1 : vector<64x128xbf16>, vector<64x128xbf16>, vector<64x128xbf16>, vector<64x128xbf16>, vector<64x128xbf16>, vector<64x128xbf16> -> vector<64x768xbf16>
    %c0_7 = arith.constant 0 : index
    %c0_8 = arith.constant 0 : index
    %24 = vector.load %arg4[%c0_7, %c0_8] : memref<768x512xbf16, #tpu.memory_space<vmem>>, vector<768x512xbf16>
    %cst_9 = arith.constant dense<0.000000e+00> : vector<64x512xf32>
    %25 = tpu.matmul %23, %24, %cst_9 {dimension_numbers = #tpu.dot_dimension_numbers<[1], [0], [0], [1], [0, 0, 1, 1], [], []>} : vector<64x768xbf16>, vector<768x512xbf16>, vector<64x512xf32> -> vector<64x512xf32>
    %26 = vector.extract_strided_slice %25 {offsets = [0, 0], sizes = [64, 128], strides = [1, 1]} : vector<64x512xf32> to vector<64x128xf32>
    %27 = vector.extract_strided_slice %25 {offsets = [0, 128], sizes = [64, 128], strides = [1, 1]} : vector<64x512xf32> to vector<64x128xf32>
    %28 = arith.maximumf %26, %27 : vector<64x128xf32>
    %29 = vector.extract_strided_slice %25 {offsets = [0, 256], sizes = [64, 128], strides = [1, 1]} : vector<64x512xf32> to vector<64x128xf32>
    %30 = vector.extract_strided_slice %25 {offsets = [0, 384], sizes = [64, 128], strides = [1, 1]} : vector<64x512xf32> to vector<64x128xf32>
    %31 = arith.maximumf %29, %30 : vector<64x128xf32>
    %32 = arith.maximumf %28, %31 : vector<64x128xf32>
    %c0_10 = arith.constant 0 : index
    %c0_11 = arith.constant 0 : index
    %33 = vector.load %arg5[%c0_10, %c0_11] : memref<1x128xf32, #tpu.memory_space<vmem>>, vector<1x128xf32>
    %34 = vector.broadcast %33 : vector<1x128xf32> to vector<64x128xf32>
    %35 = arith.addf %32, %34 : vector<64x128xf32>
    %cst_12 = arith.constant 0.000000e+00 : f32
    %36 = vector.broadcast %cst_12 : f32 to vector<64x128xf32>
    %37 = arith.maximumf %35, %36 : vector<64x128xf32>
    %38 = arith.truncf %37 : vector<64x128xf32> to vector<64x128xbf16>
    %39 = vector.extract_strided_slice %38 {offsets = [0, 0], sizes = [16, 128], strides = [1, 1]} : vector<64x128xbf16> to vector<16x128xbf16>
    %40 = vector.extract_strided_slice %38 {offsets = [16, 0], sizes = [16, 128], strides = [1, 1]} : vector<64x128xbf16> to vector<16x128xbf16>
    %41 = vector.extract_strided_slice %38 {offsets = [32, 0], sizes = [16, 128], strides = [1, 1]} : vector<64x128xbf16> to vector<16x128xbf16>
    %42 = vector.extract_strided_slice %38 {offsets = [48, 0], sizes = [16, 128], strides = [1, 1]} : vector<64x128xbf16> to vector<16x128xbf16>
    %43 = tpu.concatenate %39, %40, %41, %42 in 1 : vector<16x128xbf16>, vector<16x128xbf16>, vector<16x128xbf16>, vector<16x128xbf16> -> vector<16x512xbf16>
    %c0_13 = arith.constant 0 : index
    %c0_14 = arith.constant 0 : index
    %44 = vector.load %arg6[%c0_13, %c0_14] : memref<512x128xbf16, #tpu.memory_space<vmem>>, vector<512x128xbf16>
    %cst_15 = arith.constant dense<0.000000e+00> : vector<16x128xf32>
    %45 = tpu.matmul %43, %44, %cst_15 {dimension_numbers = #tpu.dot_dimension_numbers<[1], [0], [0], [1], [0, 0, 1, 1], [], []>} : vector<16x512xbf16>, vector<512x128xbf16>, vector<16x128xf32> -> vector<16x128xf32>
    %c0_16 = arith.constant 0 : index
    %c0_17 = arith.constant 0 : index
    %46 = vector.load %arg7[%c0_16, %c0_17] : memref<1x128xf32, #tpu.memory_space<vmem>>, vector<1x128xf32>
    %47 = vector.broadcast %46 : vector<1x128xf32> to vector<16x128xf32>
    %48 = arith.addf %45, %47 : vector<16x128xf32>
    %cst_18 = arith.constant 0.000000e+00 : f32
    %49 = vector.broadcast %cst_18 : f32 to vector<16x128xf32>
    %50 = arith.maximumf %48, %49 : vector<16x128xf32>
    %51 = arith.truncf %50 : vector<16x128xf32> to vector<16x128xbf16>
    %c0_19 = arith.constant 0 : index
    %c0_20 = arith.constant 0 : index
    %52 = vector.load %arg8[%c0_19, %c0_20] : memref<128x128xbf16, #tpu.memory_space<vmem>>, vector<128x128xbf16>
    %cst_21 = arith.constant dense<0.000000e+00> : vector<16x128xf32>
    %53 = tpu.matmul %51, %52, %cst_21 {dimension_numbers = #tpu.dot_dimension_numbers<[1], [0], [0], [1], [0, 0, 1, 1], [], []>} : vector<16x128xbf16>, vector<128x128xbf16>, vector<16x128xf32> -> vector<16x128xf32>
    %c0_22 = arith.constant 0 : index
    %c0_23 = arith.constant 0 : index
    %54 = vector.load %arg9[%c0_22, %c0_23] : memref<1x128xf32, #tpu.memory_space<vmem>>, vector<1x128xf32>
    %55 = vector.broadcast %54 : vector<1x128xf32> to vector<16x128xf32>
    %56 = arith.addf %53, %55 : vector<16x128xf32>
    %c0_24 = arith.constant 0 : index
    %c0_25 = arith.constant 0 : index
    %57 = vector.load %arg10[%c0_24, %c0_25] : memref<16x128xf32, #tpu.memory_space<vmem>>, vector<16x128xf32>
    tpu.vector_store %arg10[%c0_24, %c0_25], %56 {strides = array<i32>} : memref<16x128xf32, #tpu.memory_space<vmem>>, vector<16x128xf32>,
    return
  }
  func.func @transform_0(%arg0: i32) -> (i32, i32, i32) {
    %c0_i32 = arith.constant 0 : i32
    %c0_i32_0 = arith.constant 0 : i32
    %c0_i32_1 = arith.constant 0 : i32
    return %c0_i32, %arg0, %c0_i32_0 : i32, i32, i32
  }
  func.func @transform_1(%arg0: i32) -> (i32, i32) {
    %c0_i32 = arith.constant 0 : i32
    %c0_i32_0 = arith.constant 0 : i32
    %c0_i32_1 = arith.constant 0 : i32
    return %c0_i32, %c0_i32_0 : i32, i32
  }
  func.func @transform_2(%arg0: i32) -> (i32, i32) {
    %c0_i32 = arith.constant 0 : i32
    %c0_i32_0 = arith.constant 0 : i32
    %c0_i32_1 = arith.constant 0 : i32
    return %c0_i32, %c0_i32_0 : i32, i32
  }
  func.func @transform_3(%arg0: i32) -> (i32, i32) {
    %c0_i32 = arith.constant 0 : i32
    %c0_i32_0 = arith.constant 0 : i32
    %c0_i32_1 = arith.constant 0 : i32
    return %c0_i32, %c0_i32_0 : i32, i32
  }
  func.func @transform_4(%arg0: i32) -> (i32, i32) {
    %c0_i32 = arith.constant 0 : i32
    %c0_i32_0 = arith.constant 0 : i32
    %c0_i32_1 = arith.constant 0 : i32
    return %c0_i32, %c0_i32_0 : i32, i32
  }
  func.func @transform_5(%arg0: i32) -> (i32, i32) {
    %c0_i32 = arith.constant 0 : i32
    %c0_i32_0 = arith.constant 0 : i32
    %c0_i32_1 = arith.constant 0 : i32
    return %c0_i32, %c0_i32_0 : i32, i32
  }
  func.func @transform_6(%arg0: i32) -> (i32, i32) {
    %c0_i32 = arith.constant 0 : i32
    %c0_i32_0 = arith.constant 0 : i32
    %c0_i32_1 = arith.constant 0 : i32
    return %c0_i32, %c0_i32_0 : i32, i32
  }
  func.func @transform_7(%arg0: i32) -> (i32, i32) {
    %c0_i32 = arith.constant 0 : i32
    %c0_i32_0 = arith.constant 0 : i32
    %c0_i32_1 = arith.constant 0 : i32
    return %c0_i32, %c0_i32_0 : i32, i32
  }
  func.func @transform_8(%arg0: i32) -> (i32, i32) {
    %c0_i32 = arith.constant 0 : i32
    %c0_i32_0 = arith.constant 0 : i32
    %c0_i32_1 = arith.constant 0 : i32
    return %c0_i32, %c0_i32_0 : i32, i32
  }
  func.func @transform_9(%arg0: i32) -> (i32, i32) {
    %c0_i32 = arith.constant 0 : i32
    %c0_i32_0 = arith.constant 0 : i32
    return %arg0, %c0_i32 : i32, i32
  }
}

</mosaic_0001>

<bundles_post_ra>
// kernel: arm_lenet5_forward.1
= control target key start
LH: loop header
LB: loop body
LE: loop exit
PB: predicated region body
PF: predicated region fallthrough
CT: control target
= control target key end

     0   :  { %vm417_vm0 = vcmask 326656   ;;  %vm454_vm1 = vcmask 1043456   ;;  %vm3917_vm2 = vmmov 0   ;;  %s5017_s1 = inlined_call_operand.vmem [shape: bf16[168,512], index: 1, kind: input, shape index: {}]   ;;  %s5018_s0 = inlined_call_operand.vmem [shape: bf16[12,16,168], index: 0, kind: input, shape index: {}]   ;;  %s5019_s3 = inlined_call_operand.vmem [shape: bf16[768,512], index: 3, kind: input, shape index: {}]   ;;  %s5020_s2 = inlined_call_operand.vmem [shape: f32[1,128], index: 2, kind: input, shape index: {}]   ;;  %s5021_s5 = inlined_call_operand.vmem [shape: bf16[512,128], index: 5, kind: input, shape index: {}]   ;;  %s5022_s7 = inlined_call_operand.vmem [shape: bf16[128,128], index: 7, kind: input, shape index: {}]   ;;  %s5023_s4 = inlined_call_operand.vmem [shape: f32[1,128], index: 4, kind: input, shape index: {}]   ;;  %s5024_s6 = inlined_call_operand.vmem [shape: f32[1,128], index: 6, kind: input, shape index: {}]   ;;  %s5025_s8 = inlined_call_operand.vmem [shape: f32[1,128], index: 8, kind: input, shape index: {}]   ;;  %s5026_s9 = inlined_call_operand.vmem [shape: f32[16,128], index: 9, kind: output, shape index: {}]  }
   0x1   :  { %v3488_v0 = vld [vmem:[%s5017_s1 + $0x4] ss:$16 sps:$4 sm:$0xff]   ;;  %v3490_v1 = vld [vmem:[%s5017_s1 + $0xc] ss:$16 sps:$4 sm:$0xff]   ;;  %v3492_v2 = vld [vmem:[%s5017_s1] ss:$16 sps:$4 sm:$0xff]  }
   0x2   :  { %467 = vmatprep.subr.bf16.mxu0 %v3488_v0  ;;  %v3493_v3 = vld [vmem:[%s5017_s1 + $0x8] ss:$16 sps:$4 sm:$0xff]   ;;  %620 = vmatprep.subr.bf16.mxu1 %v3490_v1  ;;  %v3494_v4 = vld [vmem:[%s5017_s1 + $0x24] ss:$16 sps:$4 sm:$0xff]   ;;  %v3496_v5 = vld [vmem:[%s5017_s1 + $0x2c] ss:$16 sps:$4 sm:$0xff]  }
   0x3   :  { %468 = vmatpush1.bf16.msra.mxu0 %v3492_v2  ;;  %621 = vmatpush1.bf16.msra.mxu1 %v3493_v3  ;;  %v3498_v6 = vld [vmem:[%s5017_s1 + $0x20] ss:$16 sps:$4 sm:$0xff]   ;;  %v3499_v7 = vld [vmem:[%s5017_s1 + $0x28] ss:$16 sps:$4 sm:$0xff]   ;;  %v3500_v8 = vld [vmem:[%s5017_s1 + $0x44] ss:$16 sps:$4 sm:$0xff]  }
   0x4   :  { %469 = vmatprep.subr.bf16.mxu0 %v3494_v4  ;;  %622 = vmatprep.subr.bf16.mxu1 %v3496_v5  ;;  %v3502_v9 = vld [vmem:[%s5017_s1 + $0x4c] ss:$16 sps:$4 sm:$0xff]   ;;  %v3504_v10 = vld [vmem:[%s5017_s1 + $0x40] ss:$16 sps:$4 sm:$0xff]   ;;  %v3505_v11 = vld [vmem:[%s5017_s1 + $0x48] ss:$16 sps:$4 sm:$0xff]  }
   0x5   :  { %v3506_v12 = vld [vmem:[%s5017_s1 + $0x64] ss:$16 sps:$4 sm:$0xff]   ;;  %v3508_v13 = vld [vmem:[%s5017_s1 + $0x6c] ss:$16 sps:$4 sm:$0xff]   ;;  %v3510_v14 = vld [vmem:[%s5017_s1 + $0x60] ss:$16 sps:$4 sm:$0xff]  }
   0x6   :  { %v3511_v15 = vld [vmem:[%s5017_s1 + $0x68] ss:$16 sps:$4 sm:$0xff]   ;;  %v3512_v16 = vld [vmem:[%s5017_s1 + $0x84] ss:$16 sps:$4 sm:$0xff]   ;;  %v3514_v17 = vld [vmem:[%s5017_s1 + $0x8c] ss:$16 sps:$4 sm:$0xff]  }
   0x7   :  { %470 = vmatpush1.bf16.msra.mxu0 %v3498_v6  ;;  %623 = vmatpush1.bf16.msra.mxu1 %v3499_v7  ;;  %v3516_v18 = vld [vmem:[%s5017_s1 + $0x80] ss:$16 sps:$4 sm:$0xff]   ;;  %v3517_v19 = vld [vmem:[%s5017_s1 + $0x88] ss:$16 sps:$4 sm:$0xff]   ;;  %v3518_v20 = vld [vmem:[%s5017_s1 + $0xa4] ss:$16 sps:$4 sm:$0xff]  }
   0x8   :  { %471 = vmatprep.subr.bf16.mxu0 %v3500_v8  ;;  %624 = vmatprep.subr.bf16.mxu1 %v3502_v9  ;;  %v3520_v21 = vld [vmem:[%s5017_s1 + $0xac] ss:$16 sps:$4 sm:$0xff]   ;;  %v3522_v22 = vld [vmem:[%s5017_s1 + $0xa0] ss:$16 sps:$4 sm:$0xff]   ;;  %v3523_v23 = vld [vmem:[%s5017_s1 + $0xa8] ss:$16 sps:$4 sm:$0xff]  }
   0x9   :  { %v3524_v24 = vld [vmem:[%s5017_s1 + $0xc4] ss:$16 sps:$4 sm:$0xff]   ;;  %v3526_v25 = vld [vmem:[%s5017_s1 + $0xcc] ss:$16 sps:$4 sm:$0xff]   ;;  %v3528_v26 = vld [vmem:[%s5017_s1 + $0xc0] ss:$16 sps:$4 sm:$0xff]  }
   0xa   :  { %v3529_v27 = vld [vmem:[%s5017_s1 + $0xc8] ss:$16 sps:$4 sm:$0xff]   ;;  %v3530_v28 = vld [vmem:[%s5017_s1 + $0xe4] ss:$16 sps:$4 sm:$0xff]   ;;  %v3532_v29 = vld [vmem:[%s5017_s1 + $0xec] ss:$16 sps:$4 sm:$0xff]  }
   0xb   :  { %472 = vmatpush1.bf16.msra.mxu0 %v3504_v10  ;;  %625 = vmatpush1.bf16.msra.mxu1 %v3505_v11  ;;  %v3534_v30 = vld [vmem:[%s5017_s1 + $0xe0] ss:$16 sps:$4 sm:$0xff]   ;;  %v3535_v31 = vld [vmem:[%s5017_s1 + $0xe8] ss:$16 sps:$4 sm:$0xff]   ;;  %v3554_v32 = vld [vmem:[%s5018_s0 + $0x4] ss:$8 sps:$4 sm:$0xff]  }
   0xc   :  { %473 = vmatprep.subr.bf16.mxu0 %v3506_v12  ;;  %626 = vmatprep.subr.bf16.mxu1 %v3508_v13  ;;  %v3536_v33 = vld [vmem:[%s5017_s1 + $0x104] ss:$16 sps:$4 sm:$0xff]   ;;  %v3538_v34 = vld [vmem:[%s5017_s1 + $0x10c] ss:$16 sps:$4 sm:$0xff]   ;;  %v3540_v35 = vld [vmem:[%s5017_s1 + $0x100] ss:$16 sps:$4 sm:$0xff]  }
   0xd   :  { %3088 = vmatprep.mubr.msk.bf16.mxu0 %vm417_vm0, %v3554_v32  ;;  %3101 = vmatprep.mubr.msk.bf16.mxu1 %vm417_vm0, %v3554_v32  ;;  %v3541_v36 = vld [vmem:[%s5017_s1 + $0x108] ss:$16 sps:$4 sm:$0xff]   ;;  %v3542_v37 = vld [vmem:[%s5017_s1 + $0x124] ss:$16 sps:$4 sm:$0xff]   ;;  %v3544_v38 = vld [vmem:[%s5017_s1 + $0x12c] ss:$16 sps:$4 sm:$0xff]  }
   0xe   :  { %v97_v39 = vld [vmem:[%s5017_s1 + $0x140] sm:$0xff]  ;;  %v98_v40 = vld [vmem:[%s5017_s1 + $0x148] sm:$0xff]  ;;  %v3555_v51 = vld [vmem:[%s5018_s0 + $0x14] ss:$8 sps:$4 sm:$0xff]  }
   0xf   :  { %474 = vmatpush1.bf16.msra.mxu0 %v3510_v14  ;;  %627 = vmatpush1.bf16.msra.mxu1 %v3511_v15  ;;  %v3546_v41 = vld [vmem:[%s5017_s1 + $0x120] ss:$16 sps:$4 sm:$0xff]   ;;  %v3547_v42 = vld [vmem:[%s5017_s1 + $0x128] ss:$16 sps:$4 sm:$0xff]   ;;  %v3084_v43 = vcombine.high %v97_v39, %v97_v39  ;;  %v3086_v44 = vcombine.high %v98_v40, %v98_v40  ;;  %v3083_v45 = vcombine.low %v97_v39, %v97_v39  ;;  %v3587_v50 = vld [vmem:[%s5019_s3 + $0x4] ss:$16 sps:$4 sm:$0xff]  }
  0x10   :  { %475 = vmatprep.subr.bf16.mxu0 %v3512_v16  ;;  %628 = vmatprep.subr.bf16.mxu1 %v3514_v17  ;;  %v3085_v46 = vcombine.low %v98_v40, %v98_v40  ;;  %v3552_v49 = vld [vmem:[%s5018_s0] ss:$8 sps:$4 sm:$0xff]   ;;  %v3590_v52 = vld [vmem:[%s5019_s3 + $0xc] ss:$16 sps:$4 sm:$0xff]   ;;  %v3593_v55 = vld [vmem:[%s5019_s3 + $0x24] ss:$16 sps:$4 sm:$0xff]  }
  0x11   :  { %v456_v47 = vsel %vm454_vm1, %v3083_v45, 0  ;;  %v3585_v53 = vld [vmem:[%s5019_s3] ss:$16 sps:$4 sm:$0xff]   ;;  %v3588_v54 = vld [vmem:[%s5019_s3 + $0x8] ss:$16 sps:$4 sm:$0xff]  }
  0x12   :  { %v462_v48 = vsel %vm454_vm1, %v3085_v46, 0  ;;  %v3596_v56 = vld [vmem:[%s5019_s3 + $0x2c] ss:$16 sps:$4 sm:$0xff]   ;;  %v3591_v57 = vld [vmem:[%s5019_s3 + $0x20] ss:$16 sps:$4 sm:$0xff]  }
  0x13   :  { %476 = vmatpush1.bf16.msra.mxu0 %v3516_v18  ;;  %629 = vmatpush1.bf16.msra.mxu1 %v3517_v19  ;;  %v3594_v58 = vld [vmem:[%s5019_s3 + $0x28] ss:$16 sps:$4 sm:$0xff]   ;;  %v3599_v59 = vld [vmem:[%s5019_s3 + $0x44] ss:$16 sps:$4 sm:$0xff]   ;;  %v3602_v60 = vld [vmem:[%s5019_s3 + $0x4c] ss:$16 sps:$4 sm:$0xff]  }
  0x14   :  { %477 = vmatprep.subr.bf16.mxu0 %v3518_v20  ;;  %630 = vmatprep.subr.bf16.mxu1 %v3520_v21  ;;  %v3557_v61 = vld [vmem:[%s5018_s0 + $0x10] ss:$8 sps:$4 sm:$0xff]   ;;  %v3558_v62 = vld [vmem:[%s5018_s0 + $0x24] ss:$8 sps:$4 sm:$0xff]   ;;  %v3560_v4 = vld [vmem:[%s5018_s0 + $0x20] ss:$8 sps:$4 sm:$0xff]  }
  0x15   :  { %v3597_v63 = vld [vmem:[%s5019_s3 + $0x40] ss:$16 sps:$4 sm:$0xff]   ;;  %v3600_v0 = vld [vmem:[%s5019_s3 + $0x48] ss:$16 sps:$4 sm:$0xff]   ;;  %v3607_v1 = vld [vmem:[%s5019_s3 + $0x64] ss:$16 sps:$4 sm:$0xff]  }
  0x16   :  { %v3610_v2 = vld [vmem:[%s5019_s3 + $0x6c] ss:$16 sps:$4 sm:$0xff]   ;;  %v3605_v3 = vld [vmem:[%s5019_s3 + $0x60] ss:$16 sps:$4 sm:$0xff]   ;;  %v3608_v5 = vld [vmem:[%s5019_s3 + $0x68] ss:$16 sps:$4 sm:$0xff]  }
  0x17   :  { %478 = vmatpush1.bf16.msra.mxu0 %v3522_v22  ;;  %631 = vmatpush1.bf16.msra.mxu1 %v3523_v23  ;;  %v3614_v6 = vld [vmem:[%s5019_s3 + $0x84] ss:$16 sps:$4 sm:$0xff]   ;;  %v3617_v8 = vld [vmem:[%s5019_s3 + $0x8c] ss:$16 sps:$4 sm:$0xff]   ;;  %v3612_v9 = vld [vmem:[%s5019_s3 + $0x80] ss:$16 sps:$4 sm:$0xff]  }
  0x18   :  { %479 = vmatprep.subr.bf16.mxu0 %v3524_v24  ;;  %632 = vmatprep.subr.bf16.mxu1 %v3526_v25  ;;  %v3561_v7 = vld [vmem:[%s5018_s0 + $0x34] ss:$8 sps:$4 sm:$0xff]   ;;  %v3615_v10 = vld [vmem:[%s5019_s3 + $0x88] ss:$16 sps:$4 sm:$0xff]   ;;  %v3618_v13 = vld [vmem:[%s5019_s3 + $0xa0] ss:$16 sps:$4 sm:$0xff]  }
  0x19   :  { %v3620_v11 = vld [vmem:[%s5019_s3 + $0xa4] ss:$16 sps:$4 sm:$0xff]   ;;  %v3623_v12 = vld [vmem:[%s5019_s3 + $0xac] ss:$16 sps:$4 sm:$0xff]   ;;  %v3621_v14 = vld [vmem:[%s5019_s3 + $0xa8] ss:$16 sps:$4 sm:$0xff]  }
  0x1a   :  { %v3563_v15 = vld [vmem:[%s5018_s0 + $0x30] ss:$8 sps:$4 sm:$0xff]   ;;  %v3564_v16 = vld [vmem:[%s5018_s0 + $0x44] ss:$8 sps:$4 sm:$0xff]   ;;  %v3566_v17 = vld [vmem:[%s5018_s0 + $0x40] ss:$8 sps:$4 sm:$0xff]  }
  0x1b   :  { %480 = vmatpush1.bf16.msra.mxu0 %v3528_v26  ;;  %633 = vmatpush1.bf16.msra.mxu1 %v3529_v27  ;;  %v3567_v18 = vld [vmem:[%s5018_s0 + $0x54] ss:$8 sps:$4 sm:$0xff]   ;;  %v3569_v19 = vld [vmem:[%s5018_s0 + $0x50] ss:$8 sps:$4 sm:$0xff]   ;;  %v3570_v20 = vld [vmem:[%s5018_s0 + $0x64] ss:$8 sps:$4 sm:$0xff]  }
  0x1c   :  { %481 = vmatprep.subr.bf16.mxu0 %v3530_v28  ;;  %634 = vmatprep.subr.bf16.mxu1 %v3532_v29  ;;  %v3572_v21 = vld [vmem:[%s5018_s0 + $0x60] ss:$8 sps:$4 sm:$0xff]   ;;  %v3573_v22 = vld [vmem:[%s5018_s0 + $0x74] ss:$8 sps:$4 sm:$0xff]   ;;  %v3575_v23 = vld [vmem:[%s5018_s0 + $0x70] ss:$8 sps:$4 sm:$0xff]  }
  0x1d   :  { %v3576_v24 = vld [vmem:[%s5018_s0 + $0x84] ss:$8 sps:$4 sm:$0xff]   ;;  %v3578_v25 = vld [vmem:[%s5018_s0 + $0x80] ss:$8 sps:$4 sm:$0xff]   ;;  %v3579_v26 = vld [vmem:[%s5018_s0 + $0x94] ss:$8 sps:$4 sm:$0xff]  }
  0x1e   :  { %v3581_v27 = vld [vmem:[%s5018_s0 + $0x90] ss:$8 sps:$4 sm:$0xff]   ;;  %v3582_v28 = vld [vmem:[%s5018_s0 + $0xa4] ss:$8 sps:$4 sm:$0xff]   ;;  %v3584_v29 = vld [vmem:[%s5018_s0 + $0xa0] ss:$8 sps:$4 sm:$0xff]  }
  0x1f   :  { %482 = vmatpush1.bf16.msra.mxu0 %v3534_v30  ;;  %635 = vmatpush1.bf16.msra.mxu1 %v3535_v31  ;;  %v3603_v30 = vld [vmem:[%s5018_s0 + $0xb4] ss:$8 sps:$4 sm:$0xff]   ;;  %v3611_v31 = vld [vmem:[%s5018_s0 + $0xb0] ss:$8 sps:$4 sm:$0xff]  }
  0x20   :  { %483 = vmatprep.subr.bf16.mxu0 %v3536_v33  ;;  %636 = vmatprep.subr.bf16.mxu1 %v3538_v34  ;;  %v3624_v32 = vld [vmem:[%s5019_s3 + $0xc0] ss:$16 sps:$4 sm:$0xff]   ;;  %v3626_v33 = vld [vmem:[%s5019_s3 + $0xc4] ss:$16 sps:$4 sm:$0xff]   ;;  %v3627_v34 = vld [vmem:[%s5019_s3 + $0xc8] ss:$16 sps:$4 sm:$0xff]  }
  0x21   :  { %v3635_v39 = vld [vmem:[%s5019_s3 + $0xec] ss:$16 sps:$4 sm:$0xff]   ;;  %v3636_v40 = vld [vmem:[%s5019_s3 + $0x100] ss:$16 sps:$4 sm:$0xff]   ;;  %v3644_v45 = vld [vmem:[%s5019_s3 + $0x124] ss:$16 sps:$4 sm:$0xff]  }
  0x22   :  { %v3645_v46 = vld [vmem:[%s5019_s3 + $0x128] ss:$16 sps:$4 sm:$0xff]  }
  0x23   :  { %484 = vmatpush1.bf16.msra.mxu0 %v3540_v35  ;;  %637 = vmatpush1.bf16.msra.mxu1 %v3541_v36  ;;  %v3629_v35 = vld [vmem:[%s5019_s3 + $0xcc] ss:$16 sps:$4 sm:$0xff]   ;;  %v3630_v36 = vld [vmem:[%s5019_s3 + $0xe0] ss:$16 sps:$4 sm:$0xff]  }
  0x24   :  { %485 = vmatprep.subr.bf16.mxu0 %v3542_v37  ;;  %638 = vmatprep.subr.bf16.mxu1 %v3544_v38  ;;  %v3632_v37 = vld [vmem:[%s5019_s3 + $0xe4] ss:$16 sps:$4 sm:$0xff]   ;;  %v3633_v38 = vld [vmem:[%s5019_s3 + $0xe8] ss:$16 sps:$4 sm:$0xff]  }
  0x27   :  { %486 = vmatpush1.bf16.msra.mxu0 %v3546_v41  ;;  %639 = vmatpush1.bf16.msra.mxu1 %v3547_v42  ;;  %v3638_v41 = vld [vmem:[%s5019_s3 + $0x104] ss:$16 sps:$4 sm:$0xff]   ;;  %v3639_v42 = vld [vmem:[%s5019_s3 + $0x108] ss:$16 sps:$4 sm:$0xff]  }
  0x28   :  { %3087 = vmatprep.subr.msk.bf16.mxu0 %vm454_vm1, %v3084_v43  ;;  %3100 = vmatprep.subr.msk.bf16.mxu1 %vm454_vm1, %v3086_v44  ;;  %v3641_v43 = vld [vmem:[%s5019_s3 + $0x10c] ss:$16 sps:$4 sm:$0xff]   ;;  %v3642_v44 = vld [vmem:[%s5019_s3 + $0x120] ss:$16 sps:$4 sm:$0xff]  }
  0x2b   :  { %488 = vmatpush1.bf16.msra.mxu0 %v456_v47  ;;  %641 = vmatpush1.bf16.msra.mxu1 %v462_v48  ;;  %v3647_v47 = vld [vmem:[%s5019_s3 + $0x12c] ss:$16 sps:$4 sm:$0xff]   ;;  %v3648_v48 = vld [vmem:[%s5019_s3 + $0x140] ss:$16 sps:$4 sm:$0xff]  }
  0x2c   :  { %2064 = vmatprep.subr.bf16.mxu0 %v3587_v50  ;;  %2283 = vmatprep.subr.bf16.mxu1 %v3590_v52  ;;  %v3651_v50 = vld [vmem:[%s5019_s3 + $0x148] ss:$16 sps:$4 sm:$0xff]   ;;  %v3654_v52 = vld [vmem:[%s5019_s3 + $0x160] ss:$16 sps:$4 sm:$0xff]  }
  0x2e   :  { %500 = vmatmul.mubr.bf16.vlgmr.msra.gmra.mrb[0].mxu0 %v3552_v49  ;;  %653 = vmatmul.mubr.bf16.vlgmr.msra.gmra.mrb[0].mxu1 %v3552_v49  ;;  %v3650_v49 = vld [vmem:[%s5019_s3 + $0x144] ss:$16 sps:$4 sm:$0xff]  }
  0x2f   :  { %3089 = vmatprep.mubr.msk.bf16.mxu0 %vm417_vm0, %v3555_v51  ;;  %3102 = vmatprep.mubr.msk.bf16.mxu1 %vm417_vm0, %v3555_v51  ;;  %v3653_v51 = vld [vmem:[%s5019_s3 + $0x14c] ss:$16 sps:$4 sm:$0xff]  }
  0x30   :  { %2065 = vmatpush1.bf16.msra.mxu0 %v3585_v53  ;;  %2284 = vmatpush1.bf16.msra.mxu1 %v3588_v54  ;;  %v3656_v53 = vld [vmem:[%s5019_s3 + $0x164] ss:$16 sps:$4 sm:$0xff]   ;;  %v3657_v54 = vld [vmem:[%s5019_s3 + $0x168] ss:$16 sps:$4 sm:$0xff]  }
  0x31   :  { %2066 = vmatprep.subr.bf16.mxu0 %v3593_v55  ;;  %2285 = vmatprep.subr.bf16.mxu1 %v3596_v56  ;;  %v3659_v55 = vld [vmem:[%s5019_s3 + $0x16c] ss:$16 sps:$4 sm:$0xff]   ;;  %v3660_v56 = vld [vmem:[%s5019_s3 + $0x180] ss:$16 sps:$4 sm:$0xff]  }
  0x34   :  { %2067 = vmatpush1.bf16.msra.mxu0 %v3591_v57  ;;  %2286 = vmatpush1.bf16.msra.mxu1 %v3594_v58  ;;  %v3662_v57 = vld [vmem:[%s5019_s3 + $0x184] ss:$16 sps:$4 sm:$0xff]   ;;  %v3663_v58 = vld [vmem:[%s5019_s3 + $0x188] ss:$16 sps:$4 sm:$0xff]  }
  0x35   :  { %2068 = vmatprep.subr.bf16.mxu0 %v3599_v59  ;;  %2287 = vmatprep.subr.bf16.mxu1 %v3602_v60  ;;  %v3665_v59 = vld [vmem:[%s5019_s3 + $0x18c] ss:$16 sps:$4 sm:$0xff]   ;;  %v3668_v60 = vld [vmem:[%s5019_s3 + $0x1a4] ss:$16 sps:$4 sm:$0xff]  }
  0x36   :  { %510 = vmatmul.mubr.bf16.gmra.mrb[4].mxu0 %v3557_v61  ;;  %663 = vmatmul.mubr.bf16.gmra.mrb[4].mxu1 %v3557_v61  ;;  %v3671_v61 = vld [vmem:[%s5019_s3 + $0x1ac] ss:$16 sps:$4 sm:$0xff]  }
  0x37   :  { %3090 = vmatprep.mubr.msk.bf16.mxu0 %vm417_vm0, %v3558_v62  ;;  %3103 = vmatprep.mubr.msk.bf16.mxu1 %vm417_vm0, %v3558_v62  ;;  %v3666_v62 = vld [vmem:[%s5019_s3 + $0x1a0] ss:$16 sps:$4 sm:$0xff]  }
  0x38   :  { %2069 = vmatpush1.bf16.msra.mxu0 %v3597_v63  ;;  %2288 = vmatpush1.bf16.msra.mxu1 %v3600_v0  ;;  %v3669_v63 = vld [vmem:[%s5019_s3 + $0x1a8] ss:$16 sps:$4 sm:$0xff]   ;;  %v3674_v0 = vld [vmem:[%s5019_s3 + $0x1c4] ss:$16 sps:$4 sm:$0xff]  }
  0x39   :  { %2070 = vmatprep.subr.bf16.mxu0 %v3607_v1  ;;  %2289 = vmatprep.subr.bf16.mxu1 %v3610_v2  ;;  %v3677_v1 = vld [vmem:[%s5019_s3 + $0x1cc] ss:$16 sps:$4 sm:$0xff]   ;;  %v3672_v2 = vld [vmem:[%s5019_s3 + $0x1c0] ss:$16 sps:$4 sm:$0xff]  }
  0x3c   :  { %2071 = vmatpush1.bf16.msra.mxu0 %v3605_v3  ;;  %2290 = vmatpush1.bf16.msra.mxu1 %v3608_v5  ;;  %v3675_v3 = vld [vmem:[%s5019_s3 + $0x1c8] ss:$16 sps:$4 sm:$0xff]   ;;  %v3683_v5 = vld [vmem:[%s5019_s3 + $0x1ec] ss:$16 sps:$4 sm:$0xff]  }
  0x3d   :  { %2072 = vmatprep.subr.bf16.mxu0 %v3614_v6  ;;  %2291 = vmatprep.subr.bf16.mxu1 %v3617_v8  ;;  %v3678_v6 = vld [vmem:[%s5019_s3 + $0x1e0] ss:$16 sps:$4 sm:$0xff]   ;;  %v3686_v8 = vld [vmem:[%s5019_s3 + $0x204] ss:$16 sps:$4 sm:$0xff]  }
  0x3e   :  { %520 = vmatmul.mubr.bf16.gmra.mrb[8].mxu0 %v3560_v4  ;;  %673 = vmatmul.mubr.bf16.gmra.mrb[8].mxu1 %v3560_v4  ;;  %v3680_v4 = vld [vmem:[%s5019_s3 + $0x1e4] ss:$16 sps:$4 sm:$0xff]  }
  0x3f   :  { %3091 = vmatprep.mubr.msk.bf16.mxu0 %vm417_vm0, %v3561_v7  ;;  %3104 = vmatprep.mubr.msk.bf16.mxu1 %vm417_vm0, %v3561_v7  ;;  %v3681_v7 = vld [vmem:[%s5019_s3 + $0x1e8] ss:$16 sps:$4 sm:$0xff]  }
  0x40   :  { %2073 = vmatpush1.bf16.msra.mxu0 %v3612_v9  ;;  %2292 = vmatpush1.bf16.msra.mxu1 %v3615_v10  ;;  %v3689_v9 = vld [vmem:[%s5019_s3 + $0x20c] ss:$16 sps:$4 sm:$0xff]  }
  0x41   :  { %2074 = vmatprep.subr.bf16.mxu0 %v3620_v11  ;;  %2293 = vmatprep.subr.bf16.mxu1 %v3623_v12 }
  0x44   :  { %2075 = vmatpush1.bf16.msra.mxu0 %v3618_v13  ;;  %2294 = vmatpush1.bf16.msra.mxu1 %v3621_v14 }
  0x45   :  { %2076 = vmatprep.subr.bf16.mxu0 %v3626_v33  ;;  %2295 = vmatprep.subr.bf16.mxu1 %v3629_v35 }
  0x46   :  { %530 = vmatmul.mubr.bf16.gmra.mrb[12].mxu0 %v3563_v15  ;;  %683 = vmatmul.mubr.bf16.gmra.mrb[12].mxu1 %v3563_v15 }
  0x47   :  { %3092 = vmatprep.mubr.msk.bf16.mxu0 %vm417_vm0, %v3564_v16  ;;  %3105 = vmatprep.mubr.msk.bf16.mxu1 %vm417_vm0, %v3564_v16 }
  0x48   :  { %2077 = vmatpush1.bf16.msra.mxu0 %v3624_v32  ;;  %2296 = vmatpush1.bf16.msra.mxu1 %v3627_v34 }
  0x49   :  { %2078 = vmatprep.subr.bf16.mxu0 %v3632_v37  ;;  %2297 = vmatprep.subr.bf16.mxu1 %v3635_v39 }
  0x4c   :  { %2079 = vmatpush1.bf16.msra.mxu0 %v3630_v36  ;;  %2298 = vmatpush1.bf16.msra.mxu1 %v3633_v38 }
  0x4d   :  { %2080 = vmatprep.subr.bf16.mxu0 %v3638_v41  ;;  %2299 = vmatprep.subr.bf16.mxu1 %v3641_v43 }
  0x4e   :  { %540 = vmatmul.mubr.bf16.gmra.mrb[16].mxu0 %v3566_v17  ;;  %693 = vmatmul.mubr.bf16.gmra.mrb[16].mxu1 %v3566_v17 }
  0x4f   :  { %3093 = vmatprep.mubr.msk.bf16.mxu0 %vm417_vm0, %v3567_v18  ;;  %3106 = vmatprep.mubr.msk.bf16.mxu1 %vm417_vm0, %v3567_v18  ;;  %v4391_v18 = vld [vmem:[%s5020_s2] ss:$0 sm:$0xff] }
  0x50   :  { %2081 = vmatpush1.bf16.msra.mxu0 %v3636_v40  ;;  %2300 = vmatpush1.bf16.msra.mxu1 %v3639_v42 }
  0x51   :  { %2082 = vmatprep.subr.bf16.mxu0 %v3644_v45  ;;  %2301 = vmatprep.subr.bf16.mxu1 %v3647_v47 }
  0x54   :  { %2083 = vmatpush1.bf16.msra.mxu0 %v3642_v44  ;;  %2302 = vmatpush1.bf16.msra.mxu1 %v3645_v46 }
  0x55   :  { %2084 = vmatprep.subr.bf16.mxu0 %v3650_v49  ;;  %2303 = vmatprep.subr.bf16.mxu1 %v3653_v51 }
  0x56   :  { %550 = vmatmul.mubr.bf16.gmra.mrb[20].mxu0 %v3569_v19  ;;  %703 = vmatmul.mubr.bf16.gmra.mrb[20].mxu1 %v3569_v19 }
  0x57   :  { %3094 = vmatprep.mubr.msk.bf16.mxu0 %vm417_vm0, %v3570_v20  ;;  %3107 = vmatprep.mubr.msk.bf16.mxu1 %vm417_vm0, %v3570_v20 }
  0x58   :  { %2085 = vmatpush1.bf16.msra.mxu0 %v3648_v48  ;;  %2304 = vmatpush1.bf16.msra.mxu1 %v3651_v50 }
  0x59   :  { %2086 = vmatprep.subr.bf16.mxu0 %v3656_v53  ;;  %2305 = vmatprep.subr.bf16.mxu1 %v3659_v55 }
  0x5c   :  { %2087 = vmatpush1.bf16.msra.mxu0 %v3654_v52  ;;  %2306 = vmatpush1.bf16.msra.mxu1 %v3657_v54 }
  0x5d   :  { %2088 = vmatprep.subr.bf16.mxu0 %v3662_v57  ;;  %2307 = vmatprep.subr.bf16.mxu1 %v3665_v59 }
  0x5e   :  { %560 = vmatmul.mubr.bf16.gmra.mrb[24].mxu0 %v3572_v21  ;;  %713 = vmatmul.mubr.bf16.gmra.mrb[24].mxu1 %v3572_v21 }
  0x5f   :  { %3095 = vmatprep.mubr.msk.bf16.mxu0 %vm417_vm0, %v3573_v22  ;;  %3108 = vmatprep.mubr.msk.bf16.mxu1 %vm417_vm0, %v3573_v22 }
  0x60   :  { %2089 = vmatpush1.bf16.msra.mxu0 %v3660_v56  ;;  %2308 = vmatpush1.bf16.msra.mxu1 %v3663_v58 }
  0x61   :  { %2090 = vmatprep.subr.bf16.mxu0 %v3668_v60  ;;  %2309 = vmatprep.subr.bf16.mxu1 %v3671_v61 }
  0x64   :  { %2091 = vmatpush1.bf16.msra.mxu0 %v3666_v62  ;;  %2310 = vmatpush1.bf16.msra.mxu1 %v3669_v63 }
  0x65   :  { %2092 = vmatprep.subr.bf16.mxu0 %v3674_v0  ;;  %2311 = vmatprep.subr.bf16.mxu1 %v3677_v1 }
  0x66   :  { %570 = vmatmul.mubr.bf16.gmra.mrb[28].mxu0 %v3575_v23  ;;  %723 = vmatmul.mubr.bf16.gmra.mrb[28].mxu1 %v3575_v23 }
  0x67   :  { %3096 = vmatprep.mubr.msk.bf16.mxu0 %vm417_vm0, %v3576_v24  ;;  %3109 = vmatprep.mubr.msk.bf16.mxu1 %vm417_vm0, %v3576_v24 }
  0x68   :  { %2093 = vmatpush1.bf16.msra.mxu0 %v3672_v2  ;;  %2312 = vmatpush1.bf16.msra.mxu1 %v3675_v3 }
  0x69   :  { %2094 = vmatprep.subr.bf16.mxu0 %v3680_v4  ;;  %2313 = vmatprep.subr.bf16.mxu1 %v3683_v5 }
  0x6c   :  { %2095 = vmatpush1.bf16.msra.mxu0 %v3678_v6  ;;  %2314 = vmatpush1.bf16.msra.mxu1 %v3681_v7 }
  0x6d   :  { %2137 = vmatprep.subr.bf16.mxu0 %v3686_v8  ;;  %2356 = vmatprep.subr.bf16.mxu1 %v3689_v9 }
  0x6e   :  { %580 = vmatmul.mubr.bf16.gmra.mrb[32].mxu0 %v3578_v25  ;;  %733 = vmatmul.mubr.bf16.gmra.mrb[32].mxu1 %v3578_v25 }
  0x6f   :  { %3097 = vmatprep.mubr.msk.bf16.mxu0 %vm417_vm0, %v3579_v26  ;;  %3110 = vmatprep.mubr.msk.bf16.mxu1 %vm417_vm0, %v3579_v26 }
  0x76   :  { %590 = vmatmul.mubr.bf16.gmra.mrb[36].mxu0 %v3581_v27  ;;  %743 = vmatmul.mubr.bf16.gmra.mrb[36].mxu1 %v3581_v27 }
  0x77   :  { %3098 = vmatprep.mubr.msk.bf16.mxu0 %vm417_vm0, %v3582_v28  ;;  %3111 = vmatprep.mubr.msk.bf16.mxu1 %vm417_vm0, %v3582_v28 }
  0x7e   :  { %600 = vmatmul.mubr.bf16.gmra.mrb[40].mxu0 %v3584_v29  ;;  %753 = vmatmul.mubr.bf16.gmra.mrb[40].mxu1 %v3584_v29 }
  0x7f   :  { %3099 = vmatprep.mubr.msk.bf16.mxu0 %vm417_vm0, %v3603_v30  ;;  %3112 = vmatprep.mubr.msk.bf16.mxu1 %vm417_vm0, %v3603_v30 }
  0x86   :  { %610 = vmatmul.mubr.bf16.gmra.mrb[44].mxu0 %v3611_v31  ;;  %763 = vmatmul.mubr.bf16.gmra.mrb[44].mxu1 %v3611_v31 }
 0x101   :  { %v501_v10 = vpop.f32.mrb[0].mxu0  ;;  %v654_v11 = vpop.f32.mrb[0].mxu1 }
 0x102   :  { %v503_v12 = vpop.f32.mrb[1].mxu0  ;;  %v656_v13 = vpop.f32.mrb[1].mxu1 }
 0x103   :  { %v773_v14 = vmax.f32 %v501_v10, %v503_v12  ;;  %v797_v15 = vmax.f32 %v654_v11, %v656_v13  ;;  %v505_v16 = vpop.f32.mrb[2].mxu0  ;;  %v658_v17 = vpop.f32.mrb[2].mxu1 }
 0x104   :  { %v507_v19 = vpop.f32.mrb[3].mxu0  ;;  %v660_v20 = vpop.f32.mrb[3].mxu1 }
 0x105   :  { %v821_v21 = vmax.f32 %v773_v14, %v797_v15  ;;  %v774_v22 = vmax.f32 %v505_v16, %v507_v19  ;;  %v798_v23 = vmax.f32 %v658_v17, %v660_v20 }
 0x107   :  { %v852_v24 = vadd.f32 %v4391_v18, %v821_v21  ;;  %v822_v25 = vmax.f32 %v774_v22, %v798_v23 }
 0x109   :  { %v853_v26 = vadd.f32 %v4391_v18, %v822_v25  ;;  %v511_v27 = vpop.f32.mrb[4].mxu0  ;;  %v664_v28 = vpop.f32.mrb[4].mxu1  ;;  %v876_v31 = vmax.f32 %v852_v24, 0.0 }
 0x10a   :  { %v513_v29 = vpop.f32.mrb[5].mxu0  ;;  %v666_v30 = vpop.f32.mrb[5].mxu1 }
 0x10b   :  { %v877_v32 = vmax.f32 %v853_v26, 0.0  ;;  %v775_v33 = vmax.f32 %v511_v27, %v513_v29  ;;  %v799_v34 = vmax.f32 %v664_v28, %v666_v30  ;;  %v515_v35 = vpop.f32.mrb[6].mxu0  ;;  %v668_v36 = vpop.f32.mrb[6].mxu1 }
 0x10c   :  { %v517_v37 = vpop.f32.mrb[7].mxu0  ;;  %v670_v38 = vpop.f32.mrb[7].mxu1 }
 0x10d   :  { %v4395_v39 = vpack.c.bf16 %v877_v32, %v876_v31  ;;  %v823_v40 = vmax.f32 %v775_v33, %v799_v34  ;;  %v776_v41 = vmax.f32 %v515_v35, %v517_v37  ;;  %v800_v42 = vmax.f32 %v668_v36, %v670_v38 }
 0x10f   :  { %v854_v43 = vadd.f32 %v4391_v18, %v823_v40  ;;  %v824_v44 = vmax.f32 %v776_v41, %v800_v42 }
 0x111   :  { %v855_v45 = vadd.f32 %v4391_v18, %v824_v44  ;;  %v521_v46 = vpop.f32.mrb[8].mxu0  ;;  %v674_v47 = vpop.f32.mrb[8].mxu1  ;;  %v878_v50 = vmax.f32 %v854_v43, 0.0 }
 0x112   :  { %v523_v48 = vpop.f32.mrb[9].mxu0  ;;  %v676_v49 = vpop.f32.mrb[9].mxu1 }
 0x113   :  { %v879_v51 = vmax.f32 %v855_v45, 0.0  ;;  %v777_v52 = vmax.f32 %v521_v46, %v523_v48  ;;  %v801_v53 = vmax.f32 %v674_v47, %v676_v49  ;;  %v525_v54 = vpop.f32.mrb[10].mxu0  ;;  %v678_v55 = vpop.f32.mrb[10].mxu1 }
 0x114   :  { %v527_v56 = vpop.f32.mrb[11].mxu0  ;;  %v680_v57 = vpop.f32.mrb[11].mxu1 }
 0x115   :  { %v4399_v58 = vpack.c.bf16 %v879_v51, %v878_v50  ;;  %v825_v59 = vmax.f32 %v777_v52, %v801_v53  ;;  %v778_v60 = vmax.f32 %v525_v54, %v527_v56  ;;  %v802_v61 = vmax.f32 %v678_v55, %v680_v57 }
 0x117   :  { %v856_v62 = vadd.f32 %v4391_v18, %v825_v59  ;;  %v826_v63 = vmax.f32 %v778_v60, %v802_v61 }
 0x119   :  { %v857_v0 = vadd.f32 %v4391_v18, %v826_v63  ;;  %v531_v1 = vpop.f32.mrb[12].mxu0  ;;  %v684_v2 = vpop.f32.mrb[12].mxu1  ;;  %v880_v5 = vmax.f32 %v856_v62, 0.0 }
 0x11a   :  { %v533_v3 = vpop.f32.mrb[13].mxu0  ;;  %v686_v4 = vpop.f32.mrb[13].mxu1 }
 0x11b   :  { %v881_v6 = vmax.f32 %v857_v0, 0.0  ;;  %v779_v7 = vmax.f32 %v531_v1, %v533_v3  ;;  %v803_v8 = vmax.f32 %v684_v2, %v686_v4  ;;  %v535_v9 = vpop.f32.mrb[14].mxu0  ;;  %v688_v10 = vpop.f32.mrb[14].mxu1 }
 0x11c   :  { %v537_v11 = vpop.f32.mrb[15].mxu0  ;;  %v690_v12 = vpop.f32.mrb[15].mxu1 }
 0x11d   :  { %v4403_v13 = vpack.c.bf16 %v881_v6, %v880_v5  ;;  %v827_v14 = vmax.f32 %v779_v7, %v803_v8  ;;  %v780_v15 = vmax.f32 %v535_v9, %v537_v11  ;;  %v804_v16 = vmax.f32 %v688_v10, %v690_v12 }
 0x11f   :  { %v858_v17 = vadd.f32 %v4391_v18, %v827_v14  ;;  %v828_v19 = vmax.f32 %v780_v15, %v804_v16 }
 0x121   :  { %v859_v20 = vadd.f32 %v4391_v18, %v828_v19  ;;  %v541_v21 = vpop.f32.mrb[16].mxu0  ;;  %v694_v22 = vpop.f32.mrb[16].mxu1  ;;  %v882_v25 = vmax.f32 %v858_v17, 0.0 }
 0x122   :  { %v543_v23 = vpop.f32.mrb[17].mxu0  ;;  %v696_v24 = vpop.f32.mrb[17].mxu1 }
 0x123   :  { %v883_v26 = vmax.f32 %v859_v20, 0.0  ;;  %v781_v27 = vmax.f32 %v541_v21, %v543_v23  ;;  %v805_v28 = vmax.f32 %v694_v22, %v696_v24  ;;  %v545_v29 = vpop.f32.mrb[18].mxu0  ;;  %v698_v30 = vpop.f32.mrb[18].mxu1 }
 0x124   :  { %v547_v31 = vpop.f32.mrb[19].mxu0  ;;  %v700_v32 = vpop.f32.mrb[19].mxu1 }
 0x125   :  { %v4407_v33 = vpack.c.bf16 %v883_v26, %v882_v25  ;;  %v829_v34 = vmax.f32 %v781_v27, %v805_v28  ;;  %v782_v35 = vmax.f32 %v545_v29, %v547_v31  ;;  %v806_v36 = vmax.f32 %v698_v30, %v700_v32 }
 0x127   :  { %v860_v37 = vadd.f32 %v4391_v18, %v829_v34  ;;  %v830_v38 = vmax.f32 %v782_v35, %v806_v36  ;;  %v3684_v35 = vld [vmem:[%s5019_s3 + $0x200] ss:$16 sps:$4 sm:$0xff]   ;;  %v3687_v36 = vld [vmem:[%s5019_s3 + $0x208] ss:$16 sps:$4 sm:$0xff]  }
 0x129   :  { %v861_v40 = vadd.f32 %v4391_v18, %v830_v38  ;;  %v551_v41 = vpop.f32.mrb[20].mxu0  ;;  %v704_v42 = vpop.f32.mrb[20].mxu1  ;;  %v884_v45 = vmax.f32 %v860_v37, 0.0  ;;  %v3692_v37 = vld [vmem:[%s5019_s3 + $0x224] ss:$16 sps:$4 sm:$0xff]  }
 0x12a   :  { %v553_v43 = vpop.f32.mrb[21].mxu0  ;;  %v706_v44 = vpop.f32.mrb[21].mxu1  ;;  %v3695_v38 = vld [vmem:[%s5019_s3 + $0x22c] ss:$16 sps:$4 sm:$0xff]  }
 0x12b   :  { %v885_v46 = vmax.f32 %v861_v40, 0.0  ;;  %v783_v47 = vmax.f32 %v551_v41, %v553_v43  ;;  %v807_v48 = vmax.f32 %v704_v42, %v706_v44  ;;  %v555_v49 = vpop.f32.mrb[22].mxu0  ;;  %v708_v50 = vpop.f32.mrb[22].mxu1 }
 0x12c   :  { %v557_v51 = vpop.f32.mrb[23].mxu0  ;;  %v710_v52 = vpop.f32.mrb[23].mxu1 }
 0x12d   :  { %v4411_v53 = vpack.c.bf16 %v885_v46, %v884_v45  ;;  %v831_v54 = vmax.f32 %v783_v47, %v807_v48  ;;  %v784_v55 = vmax.f32 %v555_v49, %v557_v51  ;;  %v808_v56 = vmax.f32 %v708_v50, %v710_v52  ;;  %v3690_v46 = vld [vmem:[%s5019_s3 + $0x220] ss:$16 sps:$4 sm:$0xff]   ;;  %v3693_v49 = vld [vmem:[%s5019_s3 + $0x228] ss:$16 sps:$4 sm:$0xff]  }
 0x12f   :  { %v862_v57 = vadd.f32 %v4391_v18, %v831_v54  ;;  %v832_v59 = vmax.f32 %v784_v55, %v808_v56 }
 0x131   :  { %v863_v60 = vadd.f32 %v4391_v18, %v832_v59  ;;  %v561_v61 = vpop.f32.mrb[24].mxu0  ;;  %v714_v62 = vpop.f32.mrb[24].mxu1  ;;  %v886_v1 = vmax.f32 %v862_v57, 0.0  ;;  %v3701_v59 = vld [vmem:[%s5019_s3 + $0x24c] ss:$16 sps:$4 sm:$0xff]  }
 0x132   :  { %v563_v63 = vpop.f32.mrb[25].mxu0  ;;  %v716_v0 = vpop.f32.mrb[25].mxu1 }
 0x133   :  { %v887_v2 = vmax.f32 %v863_v60, 0.0  ;;  %v785_v3 = vmax.f32 %v561_v61, %v563_v63  ;;  %v809_v4 = vmax.f32 %v714_v62, %v716_v0  ;;  %v565_v5 = vpop.f32.mrb[26].mxu0  ;;  %v718_v6 = vpop.f32.mrb[26].mxu1  ;;  %v3696_v0 = vld [vmem:[%s5019_s3 + $0x240] ss:$16 sps:$4 sm:$0xff]  }
 0x134   :  { %v567_v7 = vpop.f32.mrb[27].mxu0  ;;  %v720_v8 = vpop.f32.mrb[27].mxu1 }
 0x135   :  { %v833_v9 = vmax.f32 %v785_v3, %v809_v4  ;;  %v786_v10 = vmax.f32 %v565_v5, %v567_v7  ;;  %v810_v11 = vmax.f32 %v718_v6, %v720_v8  ;;  %v4415_v12 = vpack.c.bf16 %v887_v2, %v886_v1  ;;  %v3699_v1 = vld [vmem:[%s5019_s3 + $0x248] ss:$16 sps:$4 sm:$0xff]   ;;  %v3704_v2 = vld [vmem:[%s5019_s3 + $0x264] ss:$16 sps:$4 sm:$0xff]   ;;  %v3707_v5 = vld [vmem:[%s5019_s3 + $0x26c] ss:$16 sps:$4 sm:$0xff]  }
 0x137   :  { %v864_v14 = vadd.f32 %v4391_v18, %v833_v9  ;;  %v834_v15 = vmax.f32 %v786_v10, %v810_v11  ;;  %v3702_v10 = vld [vmem:[%s5019_s3 + $0x260] ss:$16 sps:$4 sm:$0xff]  }
 0x139   :  { %v865_v16 = vadd.f32 %v4391_v18, %v834_v15  ;;  %v571_v17 = vpop.f32.mrb[28].mxu0  ;;  %v724_v19 = vpop.f32.mrb[28].mxu1  ;;  %v888_v22 = vmax.f32 %v864_v14, 0.0  ;;  %v3705_v15 = vld [vmem:[%s5019_s3 + $0x268] ss:$16 sps:$4 sm:$0xff]  }
 0x13a   :  { %v573_v20 = vpop.f32.mrb[29].mxu0  ;;  %v726_v21 = vpop.f32.mrb[29].mxu1 }
 0x13b   :  { %v889_v23 = vmax.f32 %v865_v16, 0.0  ;;  %v787_v24 = vmax.f32 %v571_v17, %v573_v20  ;;  %v811_v25 = vmax.f32 %v724_v19, %v726_v21  ;;  %v575_v26 = vpop.f32.mrb[30].mxu0  ;;  %v728_v27 = vpop.f32.mrb[30].mxu1  ;;  %v3710_v16 = vld [vmem:[%s5019_s3 + $0x284] ss:$16 sps:$4 sm:$0xff]  }
 0x13c   :  { %v577_v28 = vpop.f32.mrb[31].mxu0  ;;  %v730_v29 = vpop.f32.mrb[31].mxu1 }
 0x13d   :  { %v835_v30 = vmax.f32 %v787_v24, %v811_v25  ;;  %v788_v31 = vmax.f32 %v575_v26, %v577_v28  ;;  %v812_v32 = vmax.f32 %v728_v27, %v730_v29  ;;  %v906_v34 = vpack.c.bf16 %v889_v23, %v888_v22  ;;  %v3713_v25 = vld [vmem:[%s5019_s3 + $0x28c] ss:$16 sps:$4 sm:$0xff]  }
 0x13f   :  { %v866_v40 = vadd.f32 %v4391_v18, %v835_v30  ;;  %v836_v41 = vmax.f32 %v788_v31, %v812_v32  ;;  %2096 = vmatprep.mubr.bf16.mxu0 %v906_v34  ;;  %2315 = vmatprep.mubr.bf16.mxu1 %v906_v34  ;;  %v3708_v30 = vld [vmem:[%s5019_s3 + $0x280] ss:$16 sps:$4 sm:$0xff]   ;;  %v3711_v31 = vld [vmem:[%s5019_s3 + $0x288] ss:$16 sps:$4 sm:$0xff]   ;;  %v3716_v32 = vld [vmem:[%s5019_s3 + $0x2a4] ss:$16 sps:$4 sm:$0xff]  }
 0x140   :  { %2097 = vmatmul.mubr.bf16.vlgmr.msra.gmra.mrb[48].mxu0 %v4395_v39  ;;  %2316 = vmatmul.mubr.bf16.vlgmr.msra.gmra.mrb[48].mxu1 %v4395_v39  ;;  %v3698_v39 = vld [vmem:[%s5019_s3 + $0x244] ss:$16 sps:$4 sm:$0xff]  }
 0x141   :  { %v890_v42 = vmax.f32 %v866_v40, 0.0  ;;  %v867_v43 = vadd.f32 %v4391_v18, %v836_v41  ;;  %2138 = vmatpush1.bf16.msra.mxu0 %v3684_v35  ;;  %2357 = vmatpush1.bf16.msra.mxu1 %v3687_v36  ;;  %v581_v44 = vpop.f32.mrb[32].mxu0  ;;  %v734_v45 = vpop.f32.mrb[32].mxu1  ;;  %v3719_v36 = vld [vmem:[%s5019_s3 + $0x2ac] ss:$16 sps:$4 sm:$0xff]  }
 0x142   :  { %v583_v47 = vpop.f32.mrb[33].mxu0  ;;  %v736_v48 = vpop.f32.mrb[33].mxu1  ;;  %2139 = vmatprep.subr.bf16.mxu0 %v3692_v37  ;;  %2358 = vmatprep.subr.bf16.mxu1 %v3695_v38  ;;  %v3714_v40 = vld [vmem:[%s5019_s3 + $0x2a0] ss:$16 sps:$4 sm:$0xff]  }
 0x143   :  { %v891_v50 = vmax.f32 %v867_v43, 0.0  ;;  %v789_v51 = vmax.f32 %v581_v44, %v583_v47  ;;  %v813_v52 = vmax.f32 %v734_v45, %v736_v48  ;;  %v585_v54 = vpop.f32.mrb[34].mxu0  ;;  %v738_v55 = vpop.f32.mrb[34].mxu1  ;;  %v3717_v43 = vld [vmem:[%s5019_s3 + $0x2a8] ss:$16 sps:$4 sm:$0xff]  }
 0x144   :  { %v587_v56 = vpop.f32.mrb[35].mxu0  ;;  %v740_v57 = vpop.f32.mrb[35].mxu1  ;;  %v3722_v44 = vld [vmem:[%s5019_s3 + $0x2c4] ss:$16 sps:$4 sm:$0xff]  }
 0x145   :  { %v4447_v60 = vpack.c.bf16 %v891_v50, %v890_v42  ;;  %v837_v61 = vmax.f32 %v789_v51, %v813_v52  ;;  %v790_v62 = vmax.f32 %v585_v54, %v587_v56  ;;  %v814_v63 = vmax.f32 %v738_v55, %v740_v57  ;;  %2140 = vmatpush1.bf16.msra.mxu0 %v3690_v46  ;;  %v3725_v51 = vld [vmem:[%s5019_s3 + $0x2cc] ss:$16 sps:$4 sm:$0xff]   ;;  %v3720_v56 = vld [vmem:[%s5019_s3 + $0x2c0] ss:$16 sps:$4 sm:$0xff]  }
 0x146   :  { %2359 = vmatpush1.bf16.msra.mxu1 %v3693_v49  ;;  %2141 = vmatprep.subr.bf16.mxu0 %v3698_v39 }
 0x147   :  { %v868_v3 = vadd.f32 %v4391_v18, %v837_v61  ;;  %v838_v4 = vmax.f32 %v790_v62, %v814_v63  ;;  %2106 = vmatprep.mubr.bf16.mxu0 %v4447_v60  ;;  %2325 = vmatprep.mubr.bf16.mxu1 %v4447_v60  ;;  %v3723_v62 = vld [vmem:[%s5019_s3 + $0x2c8] ss:$16 sps:$4 sm:$0xff]   ;;  %v3728_v63 = vld [vmem:[%s5019_s3 + $0x2e4] ss:$16 sps:$4 sm:$0xff]  }
 0x148   :  { %2360 = vmatprep.subr.bf16.mxu1 %v3701_v59  ;;  %2107 = vmatmul.mubr.bf16.gmra.mrb[52].mxu0 %v4399_v58 }
 0x149   :  { %v892_v6 = vmax.f32 %v868_v3, 0.0  ;;  %v869_v7 = vadd.f32 %v4391_v18, %v838_v4  ;;  %2142 = vmatpush1.bf16.msra.mxu0 %v3696_v0  ;;  %2326 = vmatmul.mubr.bf16.gmra.mrb[52].mxu1 %v4399_v58  ;;  %v591_v8 = vpop.f32.mrb[36].mxu0  ;;  %v744_v9 = vpop.f32.mrb[36].mxu1  ;;  %v3731_v0 = vld [vmem:[%s5019_s3 + $0x2ec] ss:$16 sps:$4 sm:$0xff]  }
 0x14a   :  { %2361 = vmatpush1.bf16.msra.mxu1 %v3699_v1  ;;  %v593_v11 = vpop.f32.mrb[37].mxu0  ;;  %v746_v14 = vpop.f32.mrb[37].mxu1  ;;  %2143 = vmatprep.subr.bf16.mxu0 %v3704_v2  ;;  %v3726_v3 = vld [vmem:[%s5019_s3 + $0x2e0] ss:$16 sps:$4 sm:$0xff]   ;;  %v3729_v4 = vld [vmem:[%s5019_s3 + $0x2e8] ss:$16 sps:$4 sm:$0xff]  }
 0x14b   :  { %v893_v17 = vmax.f32 %v869_v7, 0.0  ;;  %v791_v19 = vmax.f32 %v591_v8, %v593_v11  ;;  %v815_v20 = vmax.f32 %v744_v9, %v746_v14  ;;  %v595_v21 = vpop.f32.mrb[38].mxu0  ;;  %v748_v22 = vpop.f32.mrb[38].mxu1  ;;  %2362 = vmatprep.subr.bf16.mxu1 %v3707_v5  ;;  %v3734_v9 = vld [vmem:[%s5019_s3 + $0x304] ss:$16 sps:$4 sm:$0xff]  }
 0x14c   :  { %v597_v23 = vpop.f32.mrb[39].mxu0  ;;  %v750_v24 = vpop.f32.mrb[39].mxu1 }
 0x14d   :  { %v4479_v26 = vpack.c.bf16 %v893_v17, %v892_v6  ;;  %v839_v27 = vmax.f32 %v791_v19, %v815_v20  ;;  %v792_v28 = vmax.f32 %v595_v21, %v597_v23  ;;  %v816_v29 = vmax.f32 %v748_v22, %v750_v24  ;;  %2144 = vmatpush1.bf16.msra.mxu0 %v3702_v10  ;;  %v3737_v10 = vld [vmem:[%s5019_s3 + $0x30c] ss:$16 sps:$4 sm:$0xff]   ;;  %v3735_v24 = vld [vmem:[%s5019_s3 + $0x308] ss:$16 sps:$4 sm:$0xff]  }
 0x14e   :  { %2363 = vmatpush1.bf16.msra.mxu1 %v3705_v15  ;;  %2145 = vmatprep.subr.bf16.mxu0 %v3710_v16  ;;  %v3732_v15 = vld [vmem:[%s5019_s3 + $0x300] ss:$16 sps:$4 sm:$0xff]  }
 0x14f   :  { %v870_v34 = vadd.f32 %v4391_v18, %v839_v27  ;;  %v840_v35 = vmax.f32 %v792_v28, %v816_v29  ;;  %2116 = vmatprep.mubr.bf16.mxu0 %v4479_v26  ;;  %2335 = vmatprep.mubr.bf16.mxu1 %v4479_v26 }
 0x150   :  { %2364 = vmatprep.subr.bf16.mxu1 %v3713_v25  ;;  %2117 = vmatmul.mubr.bf16.gmra.mrb[56].mxu0 %v4403_v13 }
 0x151   :  { %v894_v37 = vmax.f32 %v870_v34, 0.0  ;;  %v871_v38 = vadd.f32 %v4391_v18, %v840_v35  ;;  %2146 = vmatpush1.bf16.msra.mxu0 %v3708_v30  ;;  %2336 = vmatmul.mubr.bf16.gmra.mrb[56].mxu1 %v4403_v13  ;;  %v601_v41 = vpop.f32.mrb[40].mxu0  ;;  %v754_v42 = vpop.f32.mrb[40].mxu1  ;;  %v3740_v30 = vld [vmem:[%s5019_s3 + $0x324] ss:$16 sps:$4 sm:$0xff]  }
 0x152   :  { %2365 = vmatpush1.bf16.msra.mxu1 %v3711_v31  ;;  %2147 = vmatprep.subr.bf16.mxu0 %v3716_v32  ;;  %v603_v45 = vpop.f32.mrb[41].mxu0  ;;  %v756_v46 = vpop.f32.mrb[41].mxu1  ;;  %v3743_v31 = vld [vmem:[%s5019_s3 + $0x32c] ss:$16 sps:$4 sm:$0xff]   ;;  %v3741_v35 = vld [vmem:[%s5019_s3 + $0x328] ss:$16 sps:$4 sm:$0xff]  }
 0x153   :  { %v895_v47 = vmax.f32 %v871_v38, 0.0  ;;  %2366 = vmatprep.subr.bf16.mxu1 %v3719_v36  ;;  %v793_v48 = vmax.f32 %v601_v41, %v603_v45  ;;  %v817_v49 = vmax.f32 %v754_v42, %v756_v46  ;;  %v605_v39 = vpop.f32.mrb[42].mxu0  ;;  %v758_v50 = vpop.f32.mrb[42].mxu1  ;;  %v3746_v36 = vld [vmem:[%s5019_s3 + $0x344] ss:$16 sps:$4 sm:$0xff]  }
 0x154   :  { %v607_v52 = vpop.f32.mrb[43].mxu0  ;;  %v760_v54 = vpop.f32.mrb[43].mxu1  ;;  %v3744_v41 = vld [vmem:[%s5019_s3 + $0x340] ss:$16 sps:$4 sm:$0xff]  }
 0x155   :  { %v4511_v55 = vpack.c.bf16 %v895_v47, %v894_v37  ;;  %2148 = vmatpush1.bf16.msra.mxu0 %v3714_v40  ;;  %v841_v57 = vmax.f32 %v793_v48, %v817_v49  ;;  %v794_v59 = vmax.f32 %v605_v39, %v607_v52  ;;  %v818_v61 = vmax.f32 %v758_v50, %v760_v54  ;;  %v3749_v37 = vld [vmem:[%s5019_s3 + $0x34c] ss:$16 sps:$4 sm:$0xff]   ;;  %v3750_v46 = vld [vmem:[%s5019_s3 + $0x360] ss:$16 sps:$4 sm:$0xff]   ;;  %v3753_v47 = vld [vmem:[%s5019_s3 + $0x368] ss:$16 sps:$4 sm:$0xff]  }
 0x156   :  { %2367 = vmatpush1.bf16.msra.mxu1 %v3717_v43  ;;  %2149 = vmatprep.subr.bf16.mxu0 %v3722_v44  ;;  %v3747_v43 = vld [vmem:[%s5019_s3 + $0x348] ss:$16 sps:$4 sm:$0xff]   ;;  %v3752_v44 = vld [vmem:[%s5019_s3 + $0x364] ss:$16 sps:$4 sm:$0xff]   ;;  %v3761_v49 = vld [vmem:[%s5019_s3 + $0x38c] ss:$16 sps:$4 sm:$0xff]  }
 0x157   :  { %2126 = vmatprep.mubr.bf16.mxu0 %v4511_v55  ;;  %2345 = vmatprep.mubr.bf16.mxu1 %v4511_v55  ;;  %v872_v1 = vadd.f32 %v4391_v18, %v841_v57  ;;  %v842_v2 = vmax.f32 %v794_v59, %v818_v61  ;;  %v3758_v48 = vld [vmem:[%s5019_s3 + $0x384] ss:$16 sps:$4 sm:$0xff]   ;;  %v3756_v39 = vld [vmem:[%s5019_s3 + $0x380] ss:$16 sps:$4 sm:$0xff]   ;;  %v3759_v50 = vld [vmem:[%s5019_s3 + $0x388] ss:$16 sps:$4 sm:$0xff]  }
 0x158   :  { %2368 = vmatprep.subr.bf16.mxu1 %v3725_v51  ;;  %2127 = vmatmul.mubr.bf16.gmra.mrb[60].mxu0 %v4407_v33  ;;  %v3764_v51 = vld [vmem:[%s5019_s3 + $0x3a4] ss:$16 sps:$4 sm:$0xff]   ;;  %v3767_v52 = vld [vmem:[%s5019_s3 + $0x3ac] ss:$16 sps:$4 sm:$0xff]   ;;  %v3762_v54 = vld [vmem:[%s5019_s3 + $0x3a0] ss:$16 sps:$4 sm:$0xff]  }
 0x159   :  { %2150 = vmatpush1.bf16.msra.mxu0 %v3720_v56  ;;  %2346 = vmatmul.mubr.bf16.gmra.mrb[60].mxu1 %v4407_v33  ;;  %v896_v5 = vmax.f32 %v872_v1, 0.0  ;;  %v873_v6 = vadd.f32 %v4391_v18, %v842_v2  ;;  %v611_v7 = vpop.f32.mrb[44].mxu0  ;;  %v764_v8 = vpop.f32.mrb[44].mxu1  ;;  %v3765_v56 = vld [vmem:[%s5019_s3 + $0x3a8] ss:$16 sps:$4 sm:$0xff]  }
 0x15a   :  { %2369 = vmatpush1.bf16.msra.mxu1 %v3723_v62  ;;  %2151 = vmatprep.subr.bf16.mxu0 %v3728_v63  ;;  %v613_v11 = vpop.f32.mrb[45].mxu0  ;;  %v766_v14 = vpop.f32.mrb[45].mxu1  ;;  %v3770_v57 = vld [vmem:[%s5019_s3 + $0x3c4] ss:$16 sps:$4 sm:$0xff]   ;;  %v3773_v59 = vld [vmem:[%s5019_s3 + $0x3cc] ss:$16 sps:$4 sm:$0xff]  }
 0x15b   :  { %2370 = vmatprep.subr.bf16.mxu1 %v3731_v0  ;;  %2169 = vmatprep.mubr.bf16.mxu0 %v4447_v60  ;;  %v897_v16 = vmax.f32 %v873_v6, 0.0  ;;  %v795_v17 = vmax.f32 %v611_v7, %v613_v11  ;;  %v819_v19 = vmax.f32 %v764_v8, %v766_v14  ;;  %v615_v20 = vpop.f32.mrb[46].mxu0  ;;  %v768_v21 = vpop.f32.mrb[46].mxu1  ;;  %v3768_v61 = vld [vmem:[%s5019_s3 + $0x3c0] ss:$16 sps:$4 sm:$0xff]  }
 0x15c   :  { %2388 = vmatprep.mubr.bf16.mxu1 %v4447_v60  ;;  %v617_v22 = vpop.f32.mrb[47].mxu0  ;;  %v770_v23 = vpop.f32.mrb[47].mxu1  ;;  %v3738_v60 = vld [vmem:[%s5019_s3 + $0x320] ss:$16 sps:$4 sm:$0xff]   ;;  %v3771_v62 = vld [vmem:[%s5019_s3 + $0x3c8] ss:$16 sps:$4 sm:$0xff]  }
 0x15d   :  { %2152 = vmatpush1.bf16.msra.mxu0 %v3726_v3  ;;  %v4551_v25 = vpack.c.bf16 %v897_v16, %v896_v5  ;;  %v843_v27 = vmax.f32 %v795_v17, %v819_v19  ;;  %v796_v28 = vmax.f32 %v615_v20, %v617_v22  ;;  %v820_v29 = vmax.f32 %v768_v21, %v770_v23  ;;  %v3776_v63 = vld [vmem:[%s5019_s3 + $0x3e4] ss:$16 sps:$4 sm:$0xff]   ;;  %v3779_v0 = vld [vmem:[%s5019_s3 + $0x3ec] ss:$16 sps:$4 sm:$0xff]   ;;  %v3774_v1 = vld [vmem:[%s5019_s3 + $0x3e0] ss:$16 sps:$4 sm:$0xff]  }
 0x15e   :  { %2371 = vmatpush1.bf16.msra.mxu1 %v3729_v4  ;;  %2153 = vmatprep.subr.bf16.mxu0 %v3734_v9  ;;  %v3777_v2 = vld [vmem:[%s5019_s3 + $0x3e8] ss:$16 sps:$4 sm:$0xff]   ;;  %v3782_v3 = vld [vmem:[%s5019_s3 + $0x404] ss:$16 sps:$4 sm:$0xff]   ;;  %v3785_v4 = vld [vmem:[%s5019_s3 + $0x40c] ss:$16 sps:$4 sm:$0xff]  }
 0x15f   :  { %2372 = vmatprep.subr.bf16.mxu1 %v3737_v10  ;;  %v874_v32 = vadd.f32 %v4391_v18, %v843_v27  ;;  %v844_v34 = vmax.f32 %v796_v28, %v820_v29  ;;  %v3780_v5 = vld [vmem:[%s5019_s3 + $0x400] ss:$16 sps:$4 sm:$0xff]   ;;  %v3783_v6 = vld [vmem:[%s5019_s3 + $0x408] ss:$16 sps:$4 sm:$0xff]   ;;  %v3788_v7 = vld [vmem:[%s5019_s3 + $0x424] ss:$16 sps:$4 sm:$0xff]  }
 0x160   :  { %v3791_v8 = vld [vmem:[%s5019_s3 + $0x42c] ss:$16 sps:$4 sm:$0xff]   ;;  %v3786_v9 = vld [vmem:[%s5019_s3 + $0x420] ss:$16 sps:$4 sm:$0xff]   ;;  %v3789_v10 = vld [vmem:[%s5019_s3 + $0x428] ss:$16 sps:$4 sm:$0xff]  }
 0x161   :  { %2154 = vmatpush1.bf16.msra.mxu0 %v3732_v15  ;;  %v898_v38 = vmax.f32 %v874_v32, 0.0  ;;  %v875_v40 = vadd.f32 %v4391_v18, %v844_v34  ;;  %v3755_v18 = vld [vmem:[%s5019_s3 + $0x36c] ss:$16 sps:$4 sm:$0xff]   ;;  %v3794_v11 = vld [vmem:[%s5019_s3 + $0x444] ss:$16 sps:$4 sm:$0xff]  }
 0x162   :  { %2373 = vmatpush1.bf16.msra.mxu1 %v3735_v24  ;;  %2155 = vmatprep.subr.bf16.mxu0 %v3740_v30  ;;  %v3792_v14 = vld [vmem:[%s5019_s3 + $0x440] ss:$16 sps:$4 sm:$0xff]   ;;  %v3795_v15 = vld [vmem:[%s5019_s3 + $0x448] ss:$16 sps:$4 sm:$0xff]   ;;  %v3800_v16 = vld [vmem:[%s5019_s3 + $0x464] ss:$16 sps:$4 sm:$0xff]  }
 0x163   :  { %2374 = vmatprep.subr.bf16.mxu1 %v3743_v31  ;;  %v899_v42 = vmax.f32 %v875_v40, 0.0  ;;  %v3803_v17 = vld [vmem:[%s5019_s3 + $0x46c] ss:$16 sps:$4 sm:$0xff]   ;;  %v3798_v19 = vld [vmem:[%s5019_s3 + $0x460] ss:$16 sps:$4 sm:$0xff]  }
 0x164   :  { %v3801_v20 = vld [vmem:[%s5019_s3 + $0x468] ss:$16 sps:$4 sm:$0xff]   ;;  %v3806_v21 = vld [vmem:[%s5019_s3 + $0x484] ss:$16 sps:$4 sm:$0xff]   ;;  %v3809_v22 = vld [vmem:[%s5019_s3 + $0x48c] ss:$16 sps:$4 sm:$0xff]  }
 0x165   :  { %2156 = vmatpush1.bf16.msra.mxu0 %v3738_v60  ;;  %v4585_v45 = vpack.c.bf16 %v899_v42, %v898_v38  ;;  %v3804_v23 = vld [vmem:[%s5019_s3 + $0x480] ss:$16 sps:$4 sm:$0xff]   ;;  %v3807_v24 = vld [vmem:[%s5019_s3 + $0x488] ss:$16 sps:$4 sm:$0xff]   ;;  %v3812_v27 = vld [vmem:[%s5019_s3 + $0x4a4] ss:$16 sps:$4 sm:$0xff]  }
 0x166   :  { %2375 = vmatpush1.bf16.msra.mxu1 %v3741_v35  ;;  %2157 = vmatprep.subr.bf16.mxu0 %v3746_v36  ;;  %v3815_v28 = vld [vmem:[%s5019_s3 + $0x4ac] ss:$16 sps:$4 sm:$0xff]   ;;  %v3810_v29 = vld [vmem:[%s5019_s3 + $0x4a0] ss:$16 sps:$4 sm:$0xff]   ;;  %v3813_v30 = vld [vmem:[%s5019_s3 + $0x4a8] ss:$16 sps:$4 sm:$0xff]  }
 0x167   :  { %2376 = vmatprep.subr.bf16.mxu1 %v3749_v37  ;;  %v3818_v60 = vld [vmem:[%s5019_s3 + $0x4c4] ss:$16 sps:$4 sm:$0xff]   ;;  %v3821_v31 = vld [vmem:[%s5019_s3 + $0x4cc] ss:$16 sps:$4 sm:$0xff]   ;;  %v3816_v32 = vld [vmem:[%s5019_s3 + $0x4c0] ss:$16 sps:$4 sm:$0xff]  }
 0x168   :  { %v3819_v34 = vld [vmem:[%s5019_s3 + $0x4c8] ss:$16 sps:$4 sm:$0xff]   ;;  %v3824_v35 = vld [vmem:[%s5019_s3 + $0x4e4] ss:$16 sps:$4 sm:$0xff]   ;;  %v3827_v36 = vld [vmem:[%s5019_s3 + $0x4ec] ss:$16 sps:$4 sm:$0xff]  }
 0x169   :  { %2158 = vmatpush1.bf16.msra.mxu0 %v3744_v41  ;;  %v3822_v37 = vld [vmem:[%s5019_s3 + $0x4e0] ss:$16 sps:$4 sm:$0xff]   ;;  %v3825_v38 = vld [vmem:[%s5019_s3 + $0x4e8] ss:$16 sps:$4 sm:$0xff]   ;;  %v3830_v40 = vld [vmem:[%s5019_s3 + $0x504] ss:$16 sps:$4 sm:$0xff]  }
 0x16a   :  { %2377 = vmatpush1.bf16.msra.mxu1 %v3747_v43  ;;  %2159 = vmatprep.subr.bf16.mxu0 %v3752_v44  ;;  %v3833_v41 = vld [vmem:[%s5019_s3 + $0x50c] ss:$16 sps:$4 sm:$0xff]   ;;  %v3831_v42 = vld [vmem:[%s5019_s3 + $0x508] ss:$16 sps:$4 sm:$0xff]   ;;  %v3836_v43 = vld [vmem:[%s5019_s3 + $0x524] ss:$16 sps:$4 sm:$0xff]  }
 0x16b   :  { %2378 = vmatprep.subr.bf16.mxu1 %v3755_v18  ;;  %v3839_v44 = vld [vmem:[%s5019_s3 + $0x52c] ss:$16 sps:$4 sm:$0xff]   ;;  %v3834_v18 = vld [vmem:[%s5019_s3 + $0x520] ss:$16 sps:$4 sm:$0xff]  }
 0x16d   :  { %2160 = vmatpush1.bf16.msra.mxu0 %v3750_v46  ;;  %v3837_v46 = vld [vmem:[%s5019_s3 + $0x528] ss:$16 sps:$4 sm:$0xff]  }
 0x16e   :  { %2379 = vmatpush1.bf16.msra.mxu1 %v3753_v47  ;;  %2161 = vmatprep.subr.bf16.mxu0 %v3758_v48  ;;  %v3842_v47 = vld [vmem:[%s5019_s3 + $0x544] ss:$16 sps:$4 sm:$0xff]   ;;  %v3845_v48 = vld [vmem:[%s5019_s3 + $0x54c] ss:$16 sps:$4 sm:$0xff]  }
 0x16f   :  { %2380 = vmatprep.subr.bf16.mxu1 %v3761_v49  ;;  %v3840_v49 = vld [vmem:[%s5019_s3 + $0x540] ss:$16 sps:$4 sm:$0xff]  }
 0x171   :  { %2162 = vmatpush1.bf16.msra.mxu0 %v3756_v39  ;;  %v3843_v39 = vld [vmem:[%s5019_s3 + $0x548] ss:$16 sps:$4 sm:$0xff]  }
 0x172   :  { %2381 = vmatpush1.bf16.msra.mxu1 %v3759_v50  ;;  %2163 = vmatprep.subr.bf16.mxu0 %v3764_v51  ;;  %v3848_v50 = vld [vmem:[%s5019_s3 + $0x564] ss:$16 sps:$4 sm:$0xff]   ;;  %v3851_v51 = vld [vmem:[%s5019_s3 + $0x56c] ss:$16 sps:$4 sm:$0xff]  }
 0x173   :  { %2382 = vmatprep.subr.bf16.mxu1 %v3767_v52  ;;  %v3846_v52 = vld [vmem:[%s5019_s3 + $0x560] ss:$16 sps:$4 sm:$0xff]  }
 0x175   :  { %2164 = vmatpush1.bf16.msra.mxu0 %v3762_v54  ;;  %v3849_v54 = vld [vmem:[%s5019_s3 + $0x568] ss:$16 sps:$4 sm:$0xff]  }
 0x176   :  { %2383 = vmatpush1.bf16.msra.mxu1 %v3765_v56  ;;  %2165 = vmatprep.subr.bf16.mxu0 %v3770_v57  ;;  %v3854_v56 = vld [vmem:[%s5019_s3 + $0x584] ss:$16 sps:$4 sm:$0xff]   ;;  %v3857_v57 = vld [vmem:[%s5019_s3 + $0x58c] ss:$16 sps:$4 sm:$0xff]  }
 0x177   :  { %2384 = vmatprep.subr.bf16.mxu1 %v3773_v59  ;;  %v3852_v59 = vld [vmem:[%s5019_s3 + $0x580] ss:$16 sps:$4 sm:$0xff]  }
 0x179   :  { %2166 = vmatpush1.bf16.msra.mxu0 %v3768_v61  ;;  %v3855_v61 = vld [vmem:[%s5019_s3 + $0x588] ss:$16 sps:$4 sm:$0xff]  }
 0x17a   :  { %2385 = vmatpush1.bf16.msra.mxu1 %v3771_v62  ;;  %2167 = vmatprep.subr.bf16.mxu0 %v3776_v63  ;;  %v3860_v62 = vld [vmem:[%s5019_s3 + $0x5a4] ss:$16 sps:$4 sm:$0xff]   ;;  %v3863_v63 = vld [vmem:[%s5019_s3 + $0x5ac] ss:$16 sps:$4 sm:$0xff]  }
 0x17b   :  { %2386 = vmatprep.subr.bf16.mxu1 %v3779_v0  ;;  %v3858_v0 = vld [vmem:[%s5019_s3 + $0x5a0] ss:$16 sps:$4 sm:$0xff]  }
 0x17d   :  { %2168 = vmatpush1.bf16.msra.mxu0 %v3774_v1  ;;  %v3861_v1 = vld [vmem:[%s5019_s3 + $0x5a8] ss:$16 sps:$4 sm:$0xff]  }
 0x17e   :  { %2387 = vmatpush1.bf16.msra.mxu1 %v3777_v2  ;;  %2210 = vmatprep.subr.bf16.mxu0 %v3782_v3  ;;  %v3866_v2 = vld [vmem:[%s5019_s3 + $0x5c4] ss:$16 sps:$4 sm:$0xff]   ;;  %v3869_v3 = vld [vmem:[%s5019_s3 + $0x5cc] ss:$16 sps:$4 sm:$0xff]  }
 0x17f   :  { %2429 = vmatprep.subr.bf16.mxu1 %v3785_v4  ;;  %v3864_v4 = vld [vmem:[%s5019_s3 + $0x5c0] ss:$16 sps:$4 sm:$0xff]  }
 0x180   :  { %2170 = vmatmul.mubr.bf16.vlgmr.msra.gmra.mrb[48].mxu0 %v4399_v58 }
 0x181   :  { %2389 = vmatmul.mubr.bf16.vlgmr.msra.gmra.mrb[48].mxu1 %v4399_v58  ;;  %2179 = vmatprep.mubr.bf16.mxu0 %v4479_v26  ;;  %v3797_v58 = vld [vmem:[%s5019_s3 + $0x44c] ss:$16 sps:$4 sm:$0xff]  }
 0x182   :  { %2211 = vmatpush1.bf16.msra.mxu0 %v3780_v5  ;;  %2398 = vmatprep.mubr.bf16.mxu1 %v4479_v26  ;;  %v3867_v5 = vld [vmem:[%s5019_s3 + $0x5c8] ss:$16 sps:$4 sm:$0xff]  }
 0x183   :  { %2430 = vmatpush1.bf16.msra.mxu1 %v3783_v6  ;;  %2212 = vmatprep.subr.bf16.mxu0 %v3788_v7  ;;  %v3872_v6 = vld [vmem:[%s5019_s3 + $0x5e4] ss:$16 sps:$4 sm:$0xff]   ;;  %v3875_v7 = vld [vmem:[%s5019_s3 + $0x5ec] ss:$16 sps:$4 sm:$0xff]  }
 0x184   :  { %2431 = vmatprep.subr.bf16.mxu1 %v3791_v8  ;;  %v3870_v8 = vld [vmem:[%s5019_s3 + $0x5e0] ss:$16 sps:$4 sm:$0xff]  }
 0x186   :  { %2213 = vmatpush1.bf16.msra.mxu0 %v3786_v9  ;;  %v3873_v9 = vld [vmem:[%s5019_s3 + $0x5e8] ss:$16 sps:$4 sm:$0xff]  }
 0x187   :  { %2432 = vmatpush1.bf16.msra.mxu1 %v3789_v10  ;;  %2214 = vmatprep.subr.bf16.mxu0 %v3794_v11  ;;  %v3876_v10 = vld [vmem:[%s5021_s5 + $0x40] sm:$0xff]  }
 0x188   :  { %2180 = vmatmul.mubr.bf16.gmra.mrb[52].mxu0 %v4403_v13  ;;  %2433 = vmatprep.subr.bf16.mxu1 %v3797_v58  ;;  %v3877_v11 = vld [vmem:[%s5021_s5] sm:$0xff]   ;;  %v3878_v58 = vld [vmem:[%s5021_s5 + $0x48] sm:$0xff]  }
 0x189   :  { %2399 = vmatmul.mubr.bf16.gmra.mrb[52].mxu1 %v4403_v13  ;;  %2189 = vmatprep.mubr.bf16.mxu0 %v4511_v55 }
 0x18a   :  { %2215 = vmatpush1.bf16.msra.mxu0 %v3792_v14  ;;  %2408 = vmatprep.mubr.bf16.mxu1 %v4511_v55  ;;  %v3879_v14 = vld [vmem:[%s5021_s5 + $0x8] sm:$0xff]  }
 0x18b   :  { %2434 = vmatpush1.bf16.msra.mxu1 %v3795_v15  ;;  %2216 = vmatprep.subr.bf16.mxu0 %v3800_v16  ;;  %v3880_v15 = vld [vmem:[%s5021_s5 + $0x50] sm:$0xff]   ;;  %v3888_v16 = vld [vmem:[%s5021_s5 + $0xc8] sm:$0xff]  }
 0x18c   :  { %2435 = vmatprep.subr.bf16.mxu1 %v3803_v17  ;;  %v3889_v17 = vld [vmem:[%s5021_s5 + $0x68] sm:$0xff]  }
 0x18e   :  { %2217 = vmatpush1.bf16.msra.mxu0 %v3798_v19  ;;  %v3890_v19 = vld [vmem:[%s5021_s5 + $0x88] sm:$0xff]  }
 0x18f   :  { %2436 = vmatpush1.bf16.msra.mxu1 %v3801_v20  ;;  %2218 = vmatprep.subr.bf16.mxu0 %v3806_v21  ;;  %v3891_v20 = vld [vmem:[%s5021_s5 + $0x28] sm:$0xff]   ;;  %v3892_v21 = vld [vmem:[%s5021_s5 + $0xd0] sm:$0xff]  }
 0x190   :  { %2190 = vmatmul.mubr.bf16.gmra.mrb[56].mxu0 %v4407_v33  ;;  %2437 = vmatprep.subr.bf16.mxu1 %v3809_v22  ;;  %v3893_v22 = vld [vmem:[%s5021_s5 + $0x70] sm:$0xff]  }
 0x191   :  { %2409 = vmatmul.mubr.bf16.gmra.mrb[56].mxu1 %v4407_v33  ;;  %2199 = vmatprep.mubr.bf16.mxu0 %v4551_v25 }
 0x192   :  { %2219 = vmatpush1.bf16.msra.mxu0 %v3804_v23  ;;  %2418 = vmatprep.mubr.bf16.mxu1 %v4551_v25  ;;  %v3894_v23 = vld [vmem:[%s5021_s5 + $0x90] sm:$0xff]  }
 0x193   :  { %2438 = vmatpush1.bf16.msra.mxu1 %v3807_v24  ;;  %2220 = vmatprep.subr.bf16.mxu0 %v3812_v27  ;;  %v3895_v24 = vld [vmem:[%s5021_s5 + $0x30] sm:$0xff]   ;;  %v3896_v27 = vld [vmem:[%s5021_s5 + $0xd8] sm:$0xff]  }
 0x194   :  { %2439 = vmatprep.subr.bf16.mxu1 %v3815_v28  ;;  %v3897_v28 = vld [vmem:[%s5021_s5 + $0x78] sm:$0xff]  }
 0x196   :  { %2221 = vmatpush1.bf16.msra.mxu0 %v3810_v29  ;;  %v3898_v29 = vld [vmem:[%s5021_s5 + $0x98] sm:$0xff]  }
 0x197   :  { %2440 = vmatpush1.bf16.msra.mxu1 %v3813_v30  ;;  %2222 = vmatprep.subr.bf16.mxu0 %v3818_v60  ;;  %v3899_v30 = vld [vmem:[%s5021_s5 + $0x38] sm:$0xff]   ;;  %v3900_v60 = vld [vmem:[%s5021_s5 + $0xe0] sm:$0xff]  }
 0x198   :  { %2200 = vmatmul.mubr.bf16.gmra.mrb[60].mxu0 %v4411_v53  ;;  %2441 = vmatprep.subr.bf16.mxu1 %v3821_v31  ;;  %v3901_v31 = vld [vmem:[%s5021_s5 + $0xa0] sm:$0xff]  }
 0x199   :  { %2419 = vmatmul.mubr.bf16.gmra.mrb[60].mxu1 %v4411_v53  ;;  %2242 = vmatprep.mubr.bf16.mxu0 %v4479_v26 }
 0x19a   :  { %2223 = vmatpush1.bf16.msra.mxu0 %v3816_v32  ;;  %2461 = vmatprep.mubr.bf16.mxu1 %v4479_v26  ;;  %v3828_v26 = vld [vmem:[%s5019_s3 + $0x500] ss:$16 sps:$4 sm:$0xff]   ;;  %v3902_v32 = vld [vmem:[%s5021_s5 + $0xe8] sm:$0xff]  }
 0x19b   :  { %2442 = vmatpush1.bf16.msra.mxu1 %v3819_v34  ;;  %2224 = vmatprep.subr.bf16.mxu0 %v3824_v35  ;;  %v3903_v34 = vld [vmem:[%s5021_s5 + $0xa8] sm:$0xff]   ;;  %v3904_v35 = vld [vmem:[%s5021_s5 + $0xf0] sm:$0xff]  }
 0x19c   :  { %2443 = vmatprep.subr.bf16.mxu1 %v3827_v36  ;;  %v3905_v36 = vld [vmem:[%s5021_s5 + $0xb0] sm:$0xff]  }
 0x19e   :  { %2225 = vmatpush1.bf16.msra.mxu0 %v3822_v37  ;;  %v3906_v37 = vld [vmem:[%s5021_s5 + $0xf8] sm:$0xff]  }
 0x19f   :  { %2444 = vmatpush1.bf16.msra.mxu1 %v3825_v38  ;;  %2226 = vmatprep.subr.bf16.mxu0 %v3830_v40  ;;  %v3907_v38 = vld [vmem:[%s5021_s5 + $0xb8] sm:$0xff]   ;;  %v3916_v40 = vmov 0.0  }
 0x1a0   :  { %2445 = vmatprep.subr.bf16.mxu1 %v3833_v41 }
 0x1a2   :  { %2227 = vmatpush1.bf16.msra.mxu0 %v3828_v26 }
 0x1a3   :  { %2446 = vmatpush1.bf16.msra.mxu1 %v3831_v42  ;;  %2228 = vmatprep.subr.bf16.mxu0 %v3836_v43 }
 0x1a4   :  { %2447 = vmatprep.subr.bf16.mxu1 %v3839_v44 }
 0x1a6   :  { %2229 = vmatpush1.bf16.msra.mxu0 %v3834_v18 }
 0x1a7   :  { %2448 = vmatpush1.bf16.msra.mxu1 %v3837_v46  ;;  %2230 = vmatprep.subr.bf16.mxu0 %v3842_v47 }
 0x1a8   :  { %2449 = vmatprep.subr.bf16.mxu1 %v3845_v48 }
 0x1aa   :  { %2231 = vmatpush1.bf16.msra.mxu0 %v3840_v49  ;;  %v4963_v49 = vld [vmem:[%s5023_s4] ss:$0 sm:$0xff] }
 0x1ab   :  { %2450 = vmatpush1.bf16.msra.mxu1 %v3843_v39  ;;  %2232 = vmatprep.subr.bf16.mxu0 %v3848_v50 }
 0x1ac   :  { %2451 = vmatprep.subr.bf16.mxu1 %v3851_v51 }
 0x1ae   :  { %2233 = vmatpush1.bf16.msra.mxu0 %v3846_v52 }
 0x1af   :  { %2452 = vmatpush1.bf16.msra.mxu1 %v3849_v54  ;;  %2234 = vmatprep.subr.bf16.mxu0 %v3854_v56 }
 0x1b0   :  { %2453 = vmatprep.subr.bf16.mxu1 %v3857_v57 }
 0x1b2   :  { %2235 = vmatpush1.bf16.msra.mxu0 %v3852_v59 }
 0x1b3   :  { %2454 = vmatpush1.bf16.msra.mxu1 %v3855_v61  ;;  %2236 = vmatprep.subr.bf16.mxu0 %v3860_v62 }
 0x1b4   :  { %2455 = vmatprep.subr.bf16.mxu1 %v3863_v63 }
 0x1b6   :  { %2237 = vmatpush1.bf16.msra.mxu0 %v3858_v0 }
 0x1b7   :  { %2456 = vmatpush1.bf16.msra.mxu1 %v3861_v1  ;;  %2238 = vmatprep.subr.bf16.mxu0 %v3866_v2 }
 0x1b8   :  { %2457 = vmatprep.subr.bf16.mxu1 %v3869_v3 }
 0x1ba   :  { %2239 = vmatpush1.bf16.msra.mxu0 %v3864_v4 }
 0x1bb   :  { %2458 = vmatpush1.bf16.msra.mxu1 %v3867_v5  ;;  %2240 = vmatprep.subr.bf16.mxu0 %v3872_v6 }
 0x1bc   :  { %2459 = vmatprep.subr.bf16.mxu1 %v3875_v7 }
 0x1be   :  { %2241 = vmatpush1.bf16.msra.mxu0 %v3870_v8 }
 0x1bf   :  { %2460 = vmatpush1.bf16.msra.mxu1 %v3873_v9  ;;  %3349 = vmatprep.subr.bf16.mxu0 %v3876_v10 }
 0x1c1   :  { %2243 = vmatmul.mubr.bf16.vlgmr.msra.gmra.mrb[48].mxu0 %v4403_v13 }
 0x1c2   :  { %2462 = vmatmul.mubr.bf16.vlgmr.msra.gmra.mrb[48].mxu1 %v4403_v13  ;;  %2252 = vmatprep.mubr.bf16.mxu0 %v4511_v55  ;;  %v3881_v13 = vld [vmem:[%s5021_s5 + $0x10] sm:$0xff]  }
 0x1c3   :  { %2471 = vmatprep.mubr.bf16.mxu1 %v4511_v55  ;;  %3350 = vmatpush3.bf16.msra.mxu0 %v3877_v11  ;;  %v3884_v55 = vld [vmem:[%s5021_s5 + $0xc0] sm:$0xff]  }
 0x1c4   :  { %3351 = vmatprep.subr.bf16.mxu0 %v3878_v58  ;;  %3371 = vmatprep.subr.bf16.mxu1 %v3884_v55 }
 0x1c7   :  { %3352 = vmatpush3.bf16.msra.mxu0 %v3879_v14 }
 0x1c8   :  { %3353 = vmatprep.subr.bf16.mxu0 %v3880_v15 }
 0x1c9   :  { %2253 = vmatmul.mubr.bf16.gmra.mrb[52].mxu0 %v4407_v33 }
 0x1ca   :  { %2472 = vmatmul.mubr.bf16.gmra.mrb[52].mxu1 %v4407_v33  ;;  %2262 = vmatprep.mubr.bf16.mxu0 %v4551_v25  ;;  %v3882_v33 = vld [vmem:[%s5021_s5 + $0x58] sm:$0xff]  }
 0x1cb   :  { %2481 = vmatprep.mubr.bf16.mxu1 %v4551_v25  ;;  %3354 = vmatpush3.bf16.msra.mxu0 %v3881_v13  ;;  %v3886_v25 = vld [vmem:[%s5021_s5 + $0x80] sm:$0xff]  }
 0x1cc   :  { %3355 = vmatprep.subr.bf16.mxu0 %v3882_v33  ;;  %3372 = vmatpush3.bf16.msra.mxu1 %v3886_v25 }
 0x1cd   :  { %3373 = vmatprep.subr.bf16.mxu1 %v3888_v16 }
 0x1d0   :  { %3374 = vmatpush3.bf16.msra.mxu1 %v3890_v19 }
 0x1d1   :  { %2263 = vmatmul.mubr.bf16.gmra.mrb[56].mxu0 %v4411_v53  ;;  %3375 = vmatprep.subr.bf16.mxu1 %v3892_v21 }
 0x1d2   :  { %2482 = vmatmul.mubr.bf16.gmra.mrb[56].mxu1 %v4411_v53  ;;  %2272 = vmatprep.mubr.bf16.mxu0 %v4585_v45  ;;  %v3883_v53 = vld [vmem:[%s5021_s5 + $0x18] sm:$0xff]  }
 0x1d3   :  { %2491 = vmatprep.mubr.bf16.mxu1 %v4585_v45  ;;  %3356 = vmatpush3.bf16.msra.mxu0 %v3883_v53  ;;  %v3887_v45 = vld [vmem:[%s5021_s5 + $0x20] sm:$0xff]  }
 0x1d4   :  { %3376 = vmatpush3.bf16.msra.mxu1 %v3894_v23 }
 0x1d5   :  { %3377 = vmatprep.subr.bf16.mxu1 %v3896_v27 }
 0x1d8   :  { %3378 = vmatpush3.bf16.msra.mxu1 %v3898_v29 }
 0x1d9   :  { %2273 = vmatmul.mubr.bf16.gmra.mrb[60].mxu0 %v4415_v12  ;;  %3379 = vmatprep.subr.bf16.mxu1 %v3900_v60 }
 0x1da   :  { %2492 = vmatmul.mubr.bf16.gmra.mrb[60].mxu1 %v4415_v12  ;;  %v3885_v12 = vld [vmem:[%s5021_s5 + $0x60] sm:$0xff]  }
 0x1db   :  { %3357 = vmatprep.subr.bf16.mxu0 %v3885_v12 }
 0x1dc   :  { %3358 = vmatpush3.bf16.msra.mxu0 %v3887_v45  ;;  %3380 = vmatpush3.bf16.msra.mxu1 %v3901_v31 }
 0x1dd   :  { %3359 = vmatprep.subr.bf16.mxu0 %v3889_v17  ;;  %3381 = vmatprep.subr.bf16.mxu1 %v3902_v32 }
 0x1e0   :  { %3360 = vmatpush3.bf16.msra.mxu0 %v3891_v20  ;;  %3382 = vmatpush3.bf16.msra.mxu1 %v3903_v34 }
 0x1e1   :  { %3361 = vmatprep.subr.bf16.mxu0 %v3893_v22  ;;  %3383 = vmatprep.subr.bf16.mxu1 %v3904_v35 }
 0x1e4   :  { %3362 = vmatpush3.bf16.msra.mxu0 %v3895_v24  ;;  %3384 = vmatpush3.bf16.msra.mxu1 %v3905_v36 }
 0x1e5   :  { %3363 = vmatprep.subr.bf16.mxu0 %v3897_v28  ;;  %3385 = vmatprep.subr.bf16.mxu1 %v3906_v37  ;;  %v3908_v28 = vld [vmem:[%s5022_s7] sm:$0xff]  }
 0x1e8   :  { %3364 = vmatpush3.bf16.msra.mxu0 %v3899_v30  ;;  %3386 = vmatpush3.bf16.msra.mxu1 %v3907_v38 }
 0x1e9   :  { %3402 = vmatprep.subr.bf16.mxu0 %v3916_v40 }
 0x294   :  { %v2244_v41 = vpop.f32.mrb[48].mxu0 }
 0x295   :  { %v2463_v26 = vpop.f32.mrb[48].mxu1  ;;  %v2246_v42 = vpop.f32.mrb[49].mxu0 }
 0x296   :  { %v2502_v43 = vmax.f32 %v2244_v41, %v2246_v42  ;;  %v2465_v44 = vpop.f32.mrb[49].mxu1  ;;  %v2248_v18 = vpop.f32.mrb[50].mxu0 }
 0x297   :  { %v2510_v46 = vmax.f32 %v2463_v26, %v2465_v44  ;;  %v2467_v47 = vpop.f32.mrb[50].mxu1  ;;  %v2250_v48 = vpop.f32.mrb[51].mxu0 }
 0x298   :  { %v2503_v39 = vmax.f32 %v2248_v18, %v2250_v48  ;;  %v2469_v50 = vpop.f32.mrb[51].mxu1 }
 0x299   :  { %v2518_v51 = vmax.f32 %v2502_v43, %v2510_v46  ;;  %v2511_v52 = vmax.f32 %v2467_v47, %v2469_v50 }
 0x29b   :  { %v2533_v54 = vadd.f32 %v4963_v49, %v2518_v51  ;;  %v2519_v56 = vmax.f32 %v2503_v39, %v2511_v52 }
 0x29c   :  { %v2254_v57 = vpop.f32.mrb[52].mxu0 }
 0x29d   :  { %v2534_v59 = vadd.f32 %v4963_v49, %v2519_v56  ;;  %v2473_v61 = vpop.f32.mrb[52].mxu1  ;;  %v2256_v62 = vpop.f32.mrb[53].mxu0  ;;  %v2541_v2 = vmax.f32 %v2533_v54, 0.0 }
 0x29e   :  { %v2504_v63 = vmax.f32 %v2254_v57, %v2256_v62  ;;  %v2475_v0 = vpop.f32.mrb[53].mxu1  ;;  %v2258_v1 = vpop.f32.mrb[54].mxu0  ;;  %v3909_v57 = vld [vmem:[%s5022_s7 + $0x8] sm:$0xff]  }
 0x29f   :  { %v2542_v3 = vmax.f32 %v2534_v59, 0.0  ;;  %v2512_v4 = vmax.f32 %v2473_v61, %v2475_v0  ;;  %v2477_v5 = vpop.f32.mrb[54].mxu1  ;;  %v2260_v6 = vpop.f32.mrb[55].mxu0  ;;  %v3910_v59 = vld [vmem:[%s5022_s7 + $0x10] sm:$0xff]   ;;  %v3912_v61 = vld [vmem:[%s5022_s7 + $0x20] sm:$0xff]   ;;  %v3913_v62 = vld [vmem:[%s5022_s7 + $0x28] sm:$0xff]  }
 0x2a0   :  { %v2505_v7 = vmax.f32 %v2258_v1, %v2260_v6  ;;  %v2479_v8 = vpop.f32.mrb[55].mxu1  ;;  %v3915_v0 = vld [vmem:[%s5022_s7 + $0x38] sm:$0xff]  }
 0x2a1   :  { %v2549_v9 = vpack.c.bf16 %v2542_v3, %v2541_v2  ;;  %v2520_v10 = vmax.f32 %v2504_v63, %v2512_v4  ;;  %v2513_v11 = vmax.f32 %v2477_v5, %v2479_v8  ;;  %v3914_v63 = vld [vmem:[%s5022_s7 + $0x30] sm:$0xff]  }
 0x2a3   :  { %v2535_v58 = vadd.f32 %v4963_v49, %v2520_v10  ;;  %v2521_v14 = vmax.f32 %v2505_v7, %v2513_v11  ;;  %v3307_v7 = vld [vmem:[%s5024_s6] ss:$0 sm:$0xff] }
 0x2a4   :  { %v2264_v15 = vpop.f32.mrb[56].mxu0 }
 0x2a5   :  { %v2536_v13 = vadd.f32 %v4963_v49, %v2521_v14  ;;  %v2483_v33 = vpop.f32.mrb[56].mxu1  ;;  %v2266_v53 = vpop.f32.mrb[57].mxu0  ;;  %v2543_v45 = vmax.f32 %v2535_v58, 0.0 }
 0x2a6   :  { %v2506_v55 = vmax.f32 %v2264_v15, %v2266_v53  ;;  %v2485_v12 = vpop.f32.mrb[57].mxu1  ;;  %v2268_v25 = vpop.f32.mrb[58].mxu0 }
 0x2a7   :  { %v2544_v16 = vmax.f32 %v2536_v13, 0.0  ;;  %v2514_v17 = vmax.f32 %v2483_v33, %v2485_v12  ;;  %v2487_v19 = vpop.f32.mrb[58].mxu1  ;;  %v2270_v20 = vpop.f32.mrb[59].mxu0 }
 0x2a8   :  { %v2507_v21 = vmax.f32 %v2268_v25, %v2270_v20  ;;  %v2489_v22 = vpop.f32.mrb[59].mxu1  ;;  %v3340_v25 = vld [vmem:[%s5025_s8] ss:$0 sm:$0xff] }
 0x2a9   :  { %v2522_v23 = vmax.f32 %v2506_v55, %v2514_v17  ;;  %v2515_v24 = vmax.f32 %v2487_v19, %v2489_v22  ;;  %v2550_v27 = vpack.c.bf16 %v2544_v16, %v2543_v45 }
 0x2ab   :  { %v2537_v29 = vadd.f32 %v4963_v49, %v2522_v23  ;;  %v2523_v30 = vmax.f32 %v2507_v21, %v2515_v24  ;;  %2848 = vmatprep.mubr.bf16.mxu0 %v2550_v27 }
 0x2ac   :  { %2849 = vmatmul.mubr.bf16.vlgmr.msra.gmra.mrb[64].mxu0 %v2549_v9  ;;  %v2274_v60 = vpop.f32.mrb[60].mxu0 }
 0x2ad   :  { %v2538_v31 = vadd.f32 %v4963_v49, %v2523_v30  ;;  %v2493_v32 = vpop.f32.mrb[60].mxu1  ;;  %v2276_v34 = vpop.f32.mrb[61].mxu0  ;;  %3403 = vmatpush3.bf16.msra.mxu0 %v3908_v28  ;;  %v2545_v38 = vmax.f32 %v2537_v29, 0.0  ;;  %3418 = vmatprep.mubr.msk.bf16.mxu0 %vm3917_vm2, %v3916_v40 }
 0x2ae   :  { %v2508_v35 = vmax.f32 %v2274_v60, %v2276_v34  ;;  %v2495_v36 = vpop.f32.mrb[61].mxu1  ;;  %v2278_v37 = vpop.f32.mrb[62].mxu0  ;;  %3404 = vmatprep.subr.bf16.mxu0 %v3916_v40 }
 0x2af   :  { %v2546_v41 = vmax.f32 %v2538_v31, 0.0  ;;  %v2516_v26 = vmax.f32 %v2493_v32, %v2495_v36  ;;  %v2497_v42 = vpop.f32.mrb[62].mxu1  ;;  %v2280_v43 = vpop.f32.mrb[63].mxu0 }
 0x2b0   :  { %v2509_v44 = vmax.f32 %v2278_v37, %v2280_v43  ;;  %v2499_v18 = vpop.f32.mrb[63].mxu1 }
 0x2b1   :  { %v2551_v46 = vpack.c.bf16 %v2546_v41, %v2545_v38  ;;  %v2524_v47 = vmax.f32 %v2508_v35, %v2516_v26  ;;  %v2517_v48 = vmax.f32 %v2497_v42, %v2499_v18  ;;  %3405 = vmatpush3.bf16.msra.mxu0 %v3909_v57 }
 0x2b2   :  { %3406 = vmatprep.subr.bf16.mxu0 %v3916_v40 }
 0x2b3   :  { %v2539_v39 = vadd.f32 %v4963_v49, %v2524_v47  ;;  %v2525_v50 = vmax.f32 %v2509_v44, %v2517_v48 }
 0x2b5   :  { %v2540_v51 = vadd.f32 %v4963_v49, %v2525_v50  ;;  %v2547_v52 = vmax.f32 %v2539_v39, 0.0  ;;  %3407 = vmatpush3.bf16.msra.mxu0 %v3910_v59  ;;  %v3911_v49 = vld [vmem:[%s5022_s7 + $0x18] sm:$0xff]  }
 0x2b6   :  { %3408 = vmatprep.subr.bf16.mxu0 %v3916_v40 }
 0x2b7   :  { %v2548_v54 = vmax.f32 %v2540_v51, 0.0 }
 0x2b9   :  { %v2552_v56 = vpack.c.bf16 %v2548_v54, %v2547_v52  ;;  %3409 = vmatpush3.bf16.msra.mxu0 %v3911_v49 }
 0x2ba   :  { %3410 = vmatprep.subr.bf16.mxu0 %v3916_v40 }
 0x2bb   :  { %2889 = vmatprep.mubr.bf16.mxu1 %v2552_v56 }
 0x2bc   :  { %2890 = vmatmul.mubr.bf16.vlgmr.msra.gmra.mrb[64].mxu1 %v2551_v46 }
 0x2bd   :  { %3411 = vmatpush3.bf16.msra.mxu0 %v3912_v61 }
 0x2be   :  { %3412 = vmatprep.subr.bf16.mxu0 %v3916_v40 }
 0x2c1   :  { %3413 = vmatpush3.bf16.msra.mxu0 %v3913_v62 }
 0x2c2   :  { %3414 = vmatprep.subr.bf16.mxu0 %v3916_v40 }
 0x2c5   :  { %3415 = vmatpush3.bf16.msra.mxu0 %v3914_v63 }
 0x2c6   :  { %3416 = vmatprep.subr.bf16.mxu0 %v3916_v40 }
 0x2c9   :  { %3417 = vmatpush3.bf16.msra.mxu0 %v3915_v0 }
 0x37f   :  { %v3365_v1 = vpop.f32.mrb[64].mxu0 }
 0x380   :  { %v3366_v2 = vpop.f32.mrb[65].mxu0 }
 0x381   :  { %v3367_v3 = vadd.f32 %v3366_v2, %v3365_v1  ;;  %v3368_v4 = vpop.f32.mrb[66].mxu0 }
 0x382   :  { %v3369_v5 = vpop.f32.mrb[67].mxu0 }
 0x383   :  { %v3370_v6 = vadd.f32 %v3369_v5, %v3368_v4  ;;  %v2851_v10 = vadd.f32 %v3367_v3, %v3307_v7 }
 0x385   :  { %v2854_v15 = vadd.f32 %v3370_v6, %v3307_v7 }
 0x38f   :  { %v3387_v8 = vpop.f32.mrb[64].mxu1 }
 0x390   :  { %v3388_v9 = vpop.f32.mrb[65].mxu1 }
 0x391   :  { %v3389_v11 = vadd.f32 %v3388_v9, %v3387_v8  ;;  %v3390_v58 = vpop.f32.mrb[66].mxu1 }
 0x392   :  { %v3391_v14 = vpop.f32.mrb[67].mxu1 }
 0x393   :  { %v2892_v13 = vadd.f32 %v3389_v11, %v2851_v10  ;;  %v3392_v33 = vadd.f32 %v3391_v14, %v3390_v58 }
 0x395   :  { %v2895_v40 = vadd.f32 %v3392_v33, %v2854_v15  ;;  %v2898_v53 = vmax.f32 %v2892_v13, 0.0 }
 0x397   :  { %v2899_v55 = vmax.f32 %v2895_v40, 0.0 }
 0x399   :  { %v2900_v12 = vpack.c.bf16 %v2899_v55, %v2898_v53 }
 0x39b   :  { %3419 = vmatmul.mubr.bf16.vlgmr.msra.gmra.mrb[68].mxu0 %v2900_v12 }
 0x46e   :  { %v3006_v45 = vpop.f32.mrb[68].mxu0 }
 0x46f   :  { %v3007_v16 = vadd.f32 %v3340_v25, %v3006_v45  ;;  %v3420_v17 = vpop.f32.mrb[69].mxu0 }
 0x470   :  { %v3009_v19 = vpop.f32.mrb[70].mxu0 }
 0x471   :  { %3013 = vst [vmem:[%s5026_s9] sm:$0xff] %v3007_v16  ;;  %v3010_v20 = vadd.f32 %v3340_v25, %v3009_v19  ;;  %v3421_v21 = vpop.f32.mrb[71].mxu0 }
 0x473   :  { %3014 = vst [vmem:[%s5026_s9 + $0x8] sm:$0xff] %v3010_v20 }

</bundles_post_ra>
